<compile_context>
chip_gen: v5e
topology: v5e:2x2
jax: 0.10.0
libtpu: 0.0.40
codegen_flags: <defaults>
</compile_context>

<pallas_src>
import jax
import jax.numpy as jnp
from jax.experimental import pallas as pl
from jax.experimental.pallas import tpu as pltpu

# ---------------- model config (small, consistent with the module) ----------
STATIC_DIM = 16
SEQ_FEATURE_DIM = 12
OUTPUT_HORIZON = 4
OUTPUT_DIM = 3
HIDDEN_DIM = 32
FFN_DIM = 4 * HIDDEN_DIM
NUM_LAYERS = 2
NHEAD = 4
HEAD_DIM = HIDDEN_DIM // NHEAD          # 8
MAX_SEQ_LEN = 256
BATCH = 2
SEQ_LEN = 8
EPS = 1e-5                              # PyTorch LayerNorm default eps
OUT_RAW = OUTPUT_HORIZON * OUTPUT_DIM   # 12
OUT_PAD = 128                           # lane-dense padded output width
SLAB_LANES = 128

# ---------------- weight-slab row offsets (all bf16-tile aligned) ------------
WS1_R = 0                                            # (16, 32)
WS2_R = WS1_R + STATIC_DIM                           # 16   (32, 32)
WP1_R = WS2_R + HIDDEN_DIM                           # 48   (12, 32) in a 16-row block
WP2_R = WP1_R + 16                                   # 64   (32, 32)
LAYER_W_R = WP2_R + HIDDEN_DIM                       # 96
LAYER_W_STRIDE = 3 * HIDDEN_DIM + FFN_DIM            # 224: qkv 32 + wo 32 + w1 32 + w2 128
WPR1S_R = LAYER_W_R + NUM_LAYERS * LAYER_W_STRIDE    # 544  (32, 32)
WPR1D_R = WPR1S_R + HIDDEN_DIM                       # 576  (32, 32)
WPR2_R = WPR1D_R + HIDDEN_DIM                        # 608  (32, 12)
W_ROWS = WPR2_R + HIDDEN_DIM                         # 640

# ---------------- vector-slab row offsets ------------------------------------
POS_R = 0                                            # rows [0:256), 32 lanes
BS1_R = POS_R + MAX_SEQ_LEN                          # 256
BS2_R = BS1_R + 1
BP1_R = BS2_R + 1
BP2_R = BP1_R + 1
LAYER_V_R = BP2_R + 1                                # 260
LAYER_V_STRIDE = 8                                   # bqkv, bo, ln1w, ln1b, b1, b2, ln2w, ln2b
NWS_R = LAYER_V_R + NUM_LAYERS * LAYER_V_STRIDE      # 276
NWD_R = NWS_R + 1
NBS_R = NWD_R + 1
NBD_R = NBS_R + 1
BPR1_R = NBD_R + 1
BPR2_R = BPR1_R + 1
V_ROWS = ((BPR2_R + 1 + 7) // 8) * 8                 # 288


# ---------------- the kernel -------------------------------------------------
def dynamics_transformer_kernel(static_ref, seq_ref, w_ref, v_ref, out_ref):
    H = HIDDEN_DIM
    hd = HEAD_DIM
    N, S = static_ref.shape
    M, F = seq_ref.shape
    T = M // N
    scale = 1.0 / (float(hd) ** 0.5)

    def mm(a, w):
        # bf16 operands, f32 accumulation on the MXU.
        return jnp.dot(a.astype(jnp.bfloat16), w, preferred_element_type=jnp.float32)

    def vrow(r, width):
        return v_ref[r:r + 1, :width]                                     # (1, width) f32

    def layernorm(x, rw, rb):
        mu = jnp.mean(x, axis=-1, keepdims=True)
        xc = x - mu
        var = jnp.mean(xc * xc, axis=-1, keepdims=True)
        return xc * jax.lax.rsqrt(var + EPS) * vrow(rw, H) + vrow(rb, H)

    # ---- static encoder: Linear -> ReLU -> Linear   (N, S) -> (N, H) ----
    s = jnp.maximum(mm(static_ref[...], w_ref[WS1_R:WS1_R + S, :H]) + vrow(BS1_R, H), 0.0)
    static_feat = mm(s, w_ref[WS2_R:WS2_R + H, :H]) + vrow(BS2_R, H)          # (N, H)

    # ---- input projection (flattened to M = N*T rows) + positional embedding ----
    h = jnp.maximum(mm(seq_ref[...], w_ref[WP1_R:WP1_R + F, :H]) + vrow(BP1_R, H), 0.0)
    x = mm(h, w_ref[WP2_R:WP2_R + H, :H]) + vrow(BP2_R, H)                    # (M, H)
    pos = v_ref[POS_R:POS_R + T, :H]                                          # (T, H)
    x = (x.reshape(N, T, H) + pos).reshape(M, H)

    # ---- transformer encoder layers (post-LN, ReLU FFN, dropout = identity) ----
    for l in range(NUM_LAYERS):
        wr = LAYER_W_R + l * LAYER_W_STRIDE
        vr = LAYER_V_R + l * LAYER_V_STRIDE

        # one packed QKV matmul per layer, q/k/v sliced at 32-lane offsets
        qkv = mm(x, w_ref[wr:wr + H, :3 * H]) + vrow(vr + 0, 3 * H)           # (M, 3H)
        qkv_b = qkv.astype(jnp.bfloat16)

        ctxs = []
        for hh in range(NHEAD):
            lo = hh * hd
            qh = qkv_b[:, lo:lo + hd].reshape(N, T, hd)
            kh = qkv_b[:, H + lo:H + lo + hd].reshape(N, T, hd)
            vh = qkv_b[:, 2 * H + lo:2 * H + lo + hd].reshape(N, T, hd)
            sc = jnp.einsum('nqd,nkd->nqk', qh, kh,
                            preferred_element_type=jnp.float32) * scale
            sc = sc - jnp.max(sc, axis=-1, keepdims=True)
            p = jnp.exp(sc)
            p = p * pl.reciprocal(jnp.sum(p, axis=-1, keepdims=True), approx=True)
            ctx = jnp.einsum('nqk,nkd->nqd', p.astype(jnp.bfloat16), vh,
                             preferred_element_type=jnp.float32)              # (N, T, hd)
            ctxs.append(ctx.reshape(M, hd))

        # single out-projection matmul over lane-concatenated heads
        attn = mm(jnp.concatenate(ctxs, axis=-1),
                  w_ref[wr + H:wr + 2 * H, :H]) + vrow(vr + 1, H)             # (M, H)
        x = layernorm(x + attn, vr + 2, vr + 3)

        ff = jnp.maximum(mm(x, w_ref[wr + 2 * H:wr + 3 * H, :FFN_DIM])
                         + vrow(vr + 4, FFN_DIM), 0.0)
        ff = mm(ff, w_ref[wr + 3 * H:wr + 3 * H + FFN_DIM, :H]) + vrow(vr + 5, H)
        x = layernorm(x + ff, vr + 6, vr + 7)

    # ---- fuse last-timestep dynamic features with static features ----------
    dyn = x.reshape(N, T, H)[:, T - 1, :]                                     # (N, H)

    # LayerNorm over the (virtual) concat [static_feat, dyn] of width 2H,
    # computed without a lane concat.
    two_h = jnp.float32(2 * H)
    mu = (jnp.sum(static_feat, axis=-1, keepdims=True)
          + jnp.sum(dyn, axis=-1, keepdims=True)) / two_h
    cs = static_feat - mu
    cd = dyn - mu
    var = (jnp.sum(cs * cs, axis=-1, keepdims=True)
           + jnp.sum(cd * cd, axis=-1, keepdims=True)) / two_h
    inv_std = jax.lax.rsqrt(var + EPS)
    norm_s = cs * inv_std * vrow(NWS_R, H) + vrow(NBS_R, H)
    norm_d = cd * inv_std * vrow(NWD_R, H) + vrow(NBD_R, H)

    # ---- predictor: Linear -> ReLU -> Linear (first Linear split in halves) ----
    p1 = jnp.maximum(mm(norm_s, w_ref[WPR1S_R:WPR1S_R + H, :H])
                     + mm(norm_d, w_ref[WPR1D_R:WPR1D_R + H, :H])
                     + vrow(BPR1_R, H), 0.0)
    out_ref[...] = mm(p1, w_ref[WPR2_R:WPR2_R + H, :OUT_PAD]) + vrow(BPR2_R, OUT_PAD)


# ---------------- deterministic parameter construction (PyTorch layout) ------
def _linear(key, out_dim, in_dim):
    k1, k2 = jax.random.split(key)
    bound = 1.0 / (in_dim ** 0.5)
    w = jax.random.uniform(k1, (out_dim, in_dim), jnp.float32, -bound, bound)
    b = jax.random.uniform(k2, (1, out_dim), jnp.float32, -bound, bound)
    return w, b


def init_params(key):
    keys = iter(jax.random.split(key, 64))
    p = {}
    H = HIDDEN_DIM
    # static encoder
    p['ws1'], p['bs1'] = _linear(next(keys), H, STATIC_DIM)
    p['ws2'], p['bs2'] = _linear(next(keys), H, H)
    # input projection
    p['wp1'], p['bp1'] = _linear(next(keys), H, SEQ_FEATURE_DIM)
    p['wp2'], p['bp2'] = _linear(next(keys), H, H)
    # positional embedding
    p['pos'] = 0.02 * jax.random.normal(next(keys), (1, MAX_SEQ_LEN, H), jnp.float32)
    # transformer layers (stacked along leading L axis, PyTorch packing)
    wqkv, bqkv, wo, bo = [], [], [], []
    ln1w, ln1b, ln2w, ln2b = [], [], [], []
    w1, b1, w2, b2 = [], [], [], []
    for _ in range(NUM_LAYERS):
        w, b = _linear(next(keys), 3 * H, H); wqkv.append(w); bqkv.append(b)
        w, b = _linear(next(keys), H, H);     wo.append(w);   bo.append(b)
        ln1w.append(jnp.ones((1, H), jnp.float32)); ln1b.append(jnp.zeros((1, H), jnp.float32))
        ln2w.append(jnp.ones((1, H), jnp.float32)); ln2b.append(jnp.zeros((1, H), jnp.float32))
        w, b = _linear(next(keys), FFN_DIM, H); w1.append(w); b1.append(b)
        w, b = _linear(next(keys), H, FFN_DIM); w2.append(w); b2.append(b)
    for name, lst in [('wqkv', wqkv), ('bqkv', bqkv), ('wo', wo), ('bo', bo),
                      ('ln1w', ln1w), ('ln1b', ln1b), ('ln2w', ln2w), ('ln2b', ln2b),
                      ('w1', w1), ('b1', b1), ('w2', w2), ('b2', b2)]:
        p[name] = jnp.stack(lst, axis=0)
    # fusion LayerNorm(2H)
    p['nw'] = jnp.ones((1, 2 * H), jnp.float32)
    p['nb'] = jnp.zeros((1, 2 * H), jnp.float32)
    # predictor
    p['wpr1'], p['bpr1'] = _linear(next(keys), H, 2 * H)
    p['wpr2'], p['bpr2'] = _linear(next(keys), OUT_RAW, H)
    return p


# ---------------- one-time host-side slab packing -----------------------------
def prepare_kernel_params(p):
    """Pack all weights into one bf16 slab and all vectors into one f32 slab."""
    H = HIDDEN_DIM

    def put(slab, r, mat):
        rows, cols = mat.shape
        return slab.at[r:r + rows, :cols].set(mat)

    def put_row(slab, r, vec):
        vec = vec.reshape(-1)
        return slab.at[r, :vec.shape[0]].set(vec)

    # ---- weight slab (pre-transposed to (in, out), bf16) ----
    w = jnp.zeros((W_ROWS, SLAB_LANES), jnp.float32)
    w = put(w, WS1_R, p['ws1'].T)
    w = put(w, WS2_R, p['ws2'].T)
    w = put(w, WP1_R, p['wp1'].T)                       # 12 real rows in a 16-row block
    w = put(w, WP2_R, p['wp2'].T)
    for l in range(NUM_LAYERS):
        wr = LAYER_W_R + l * LAYER_W_STRIDE
        w = put(w, wr, p['wqkv'][l].T)                  # (32, 96) packed q|k|v
        w = put(w, wr + H, p['wo'][l].T)                # (32, 32)
        w = put(w, wr + 2 * H, p['w1'][l].T)            # (32, 128)
        w = put(w, wr + 3 * H, p['w2'][l].T)            # (128, 32)
    wpr1_t = p['wpr1'].T                                # (2H, H)
    w = put(w, WPR1S_R, wpr1_t[:H])
    w = put(w, WPR1D_R, wpr1_t[H:])
    w = put(w, WPR2_R, p['wpr2'].T)                     # (32, 12), lanes 12..127 stay 0
    wslab = w.astype(jnp.bfloat16)

    # ---- vector slab (pos + biases + LayerNorm params, f32) ----
    v = jnp.zeros((V_ROWS, SLAB_LANES), jnp.float32)
    v = put(v, POS_R, p['pos'][0])                      # (256, 32)
    v = put_row(v, BS1_R, p['bs1']); v = put_row(v, BS2_R, p['bs2'])
    v = put_row(v, BP1_R, p['bp1']); v = put_row(v, BP2_R, p['bp2'])
    for l in range(NUM_LAYERS):
        vr = LAYER_V_R + l * LAYER_V_STRIDE
        v = put_row(v, vr + 0, p['bqkv'][l])            # 96-wide packed bias
        v = put_row(v, vr + 1, p['bo'][l])
        v = put_row(v, vr + 2, p['ln1w'][l]); v = put_row(v, vr + 3, p['ln1b'][l])
        v = put_row(v, vr + 4, p['b1'][l]);   v = put_row(v, vr + 5, p['b2'][l])
        v = put_row(v, vr + 6, p['ln2w'][l]); v = put_row(v, vr + 7, p['ln2b'][l])
    v = put_row(v, NWS_R, p['nw'][:, :H]); v = put_row(v, NWD_R, p['nw'][:, H:])
    v = put_row(v, NBS_R, p['nb'][:, :H]); v = put_row(v, NBD_R, p['nb'][:, H:])
    v = put_row(v, BPR1_R, p['bpr1'])
    v = put_row(v, BPR2_R, p['bpr2'])                   # 12 real lanes, rest 0
    return {'wslab': wslab, 'vslab': v}


# ---------------- wrapper -----------------------------------------------------
def dynamics_transformer(static_input, sequence_input, kp):
    n, t, f = sequence_input.shape
    seq2d = sequence_input.reshape(n * t, f)            # metadata-only reshape
    out = pl.pallas_call(
        dynamics_transformer_kernel,
        out_shape=jax.ShapeDtypeStruct((n, OUT_PAD), jnp.float32),
        in_specs=[pl.BlockSpec(memory_space=pltpu.MemorySpace.VMEM)] * 4,
        out_specs=pl.BlockSpec(memory_space=pltpu.MemorySpace.VMEM),
    )(static_input, seq2d, kp['wslab'], kp['vslab'])
    return out[:, :OUT_RAW].reshape(n, OUTPUT_HORIZON, OUTPUT_DIM)


# ---------------- pure-JAX reference (PyTorch semantics) ----------------------
def reference_forward(static_input, sequence_input, p):
    H = HIDDEN_DIM

    def layernorm(x, w, b):
        mu = x.mean(-1, keepdims=True)
        var = ((x - mu) ** 2).mean(-1, keepdims=True)
        return (x - mu) / jnp.sqrt(var + EPS) * w + b

    n, t, _ = sequence_input.shape
    s = jnp.maximum(static_input @ p['ws1'].T + p['bs1'], 0.0)
    static_feat = s @ p['ws2'].T + p['bs2']
    h = jnp.maximum(sequence_input @ p['wp1'].T + p['bp1'], 0.0)
    x = h @ p['wp2'].T + p['bp2'] + p['pos'][:, :t, :]
    for l in range(NUM_LAYERS):
        qkv = x @ p['wqkv'][l].T + p['bqkv'][l]
        q, k, v = qkv[..., :H], qkv[..., H:2 * H], qkv[..., 2 * H:]

        def split(z):
            return z.reshape(n, t, NHEAD, HEAD_DIM).transpose(0, 2, 1, 3)

        qh, kh, vh = split(q), split(k), split(v)
        sc = jnp.einsum('nhqd,nhkd->nhqk', qh, kh) / (HEAD_DIM ** 0.5)
        pr = jax.nn.softmax(sc, axis=-1)
        ctx = jnp.einsum('nhqk,nhkd->nhqd', pr, vh)
        ctx = ctx.transpose(0, 2, 1, 3).reshape(n, t, H)
        attn = ctx @ p['wo'][l].T + p['bo'][l]
        x = layernorm(x + attn, p['ln1w'][l], p['ln1b'][l])
        ff = jnp.maximum(x @ p['w1'][l].T + p['b1'][l], 0.0)
        ff = ff @ p['w2'][l].T + p['b2'][l]
        x = layernorm(x + ff, p['ln2w'][l], p['ln2b'][l])
    dyn = x[:, -1, :]
    fused = layernorm(jnp.concatenate([static_feat, dyn], axis=-1), p['nw'], p['nb'])
    out = jnp.maximum(fused @ p['wpr1'].T + p['bpr1'], 0.0) @ p['wpr2'].T + p['bpr2']
    return out.reshape(-1, OUTPUT_HORIZON, OUTPUT_DIM)


if __name__ == "__main__":
    key = jax.random.PRNGKey(0)
    k_params, k_static, k_seq = jax.random.split(key, 3)
    params = init_params(k_params)
    kparams = prepare_kernel_params(params)

    static_input = jax.random.normal(k_static, (BATCH, STATIC_DIM), jnp.float32)
    sequence_input = jax.random.normal(k_seq, (BATCH, SEQ_LEN, SEQ_FEATURE_DIM), jnp.float32)

    forward = jax.jit(dynamics_transformer)
    out = forward(static_input, sequence_input, kparams)
    jax.block_until_ready(out)
    assert out.shape == (BATCH, OUTPUT_HORIZON, OUTPUT_DIM), out.shape

    ref = reference_forward(static_input, sequence_input, params)
    max_err = float(jnp.max(jnp.abs(out - ref)))
    assert max_err < 3e-2, f"max abs err vs reference: {max_err}"
    print("KERNEL_OK")
</pallas_src>

<mosaic_0001>
module attributes {stable_mosaic.version = 11 : i64} {
  func.func @dynamics_transformer_kernel(%arg0: memref<2x16xf32, #tpu.memory_space<vmem>>, %arg1: memref<16x12xf32, #tpu.memory_space<vmem>>, %arg2: memref<640x128xbf16, #tpu.memory_space<vmem>>, %arg3: memref<288x128xf32, #tpu.memory_space<vmem>>, %arg4: memref<2x128xf32, #tpu.memory_space<vmem>>) attributes {dimension_semantics = [], scalar_prefetch = 0 : i64, scratch_operands = 0 : i64, tpu.core_type = #tpu.core_type<tc>} {
    %c0 = arith.constant 0 : index
    %c0_0 = arith.constant 0 : index
    %0 = vector.load %arg0[%c0, %c0_0] : memref<2x16xf32, #tpu.memory_space<vmem>>, vector<2x16xf32>
    %c0_1 = arith.constant 0 : index
    %c0_2 = arith.constant 0 : index
    %1 = vector.load %arg2[%c0_1, %c0_2] : memref<640x128xbf16, #tpu.memory_space<vmem>>, vector<16x32xbf16>
    %2 = arith.truncf %0 : vector<2x16xf32> to vector<2x16xbf16>
    %cst = arith.constant dense<0.000000e+00> : vector<2x32xf32>
    %3 = tpu.matmul %2, %1, %cst {dimension_numbers = #tpu.dot_dimension_numbers<[1], [0], [0], [1], [0, 0, 1, 1], [], []>} : vector<2x16xbf16>, vector<16x32xbf16>, vector<2x32xf32> -> vector<2x32xf32>
    %c256 = arith.constant 256 : index
    %c0_3 = arith.constant 0 : index
    %4 = vector.load %arg3[%c256, %c0_3] : memref<288x128xf32, #tpu.memory_space<vmem>>, vector<1x32xf32>
    %5 = vector.broadcast %4 : vector<1x32xf32> to vector<2x32xf32>
    %6 = arith.addf %3, %5 : vector<2x32xf32>
    %cst_4 = arith.constant 0.000000e+00 : f32
    %7 = vector.broadcast %cst_4 : f32 to vector<2x32xf32>
    %8 = arith.maximumf %6, %7 : vector<2x32xf32>
    %c16 = arith.constant 16 : index
    %c0_5 = arith.constant 0 : index
    %9 = vector.load %arg2[%c16, %c0_5] : memref<640x128xbf16, #tpu.memory_space<vmem>>, vector<32x32xbf16>
    %10 = arith.truncf %8 : vector<2x32xf32> to vector<2x32xbf16>
    %cst_6 = arith.constant dense<0.000000e+00> : vector<2x32xf32>
    %11 = tpu.matmul %10, %9, %cst_6 {dimension_numbers = #tpu.dot_dimension_numbers<[1], [0], [0], [1], [0, 0, 1, 1], [], []>} : vector<2x32xbf16>, vector<32x32xbf16>, vector<2x32xf32> -> vector<2x32xf32>
    %c257 = arith.constant 257 : index
    %c0_7 = arith.constant 0 : index
    %12 = vector.load %arg3[%c257, %c0_7] : memref<288x128xf32, #tpu.memory_space<vmem>>, vector<1x32xf32>
    %13 = vector.broadcast %12 : vector<1x32xf32> to vector<2x32xf32>
    %14 = arith.addf %11, %13 : vector<2x32xf32>
    %c0_8 = arith.constant 0 : index
    %c0_9 = arith.constant 0 : index
    %15 = vector.load %arg1[%c0_8, %c0_9] : memref<16x12xf32, #tpu.memory_space<vmem>>, vector<16x12xf32>
    %c48 = arith.constant 48 : index
    %c0_10 = arith.constant 0 : index
    %16 = vector.load %arg2[%c48, %c0_10] : memref<640x128xbf16, #tpu.memory_space<vmem>>, vector<12x32xbf16>
    %17 = arith.truncf %15 : vector<16x12xf32> to vector<16x12xbf16>
    %cst_11 = arith.constant dense<0.000000e+00> : vector<16x32xf32>
    %18 = tpu.matmul %17, %16, %cst_11 {dimension_numbers = #tpu.dot_dimension_numbers<[1], [0], [0], [1], [0, 0, 1, 1], [], []>} : vector<16x12xbf16>, vector<12x32xbf16>, vector<16x32xf32> -> vector<16x32xf32>
    %c258 = arith.constant 258 : index
    %c0_12 = arith.constant 0 : index
    %19 = vector.load %arg3[%c258, %c0_12] : memref<288x128xf32, #tpu.memory_space<vmem>>, vector<1x32xf32>
    %20 = vector.broadcast %19 : vector<1x32xf32> to vector<16x32xf32>
    %21 = arith.addf %18, %20 : vector<16x32xf32>
    %cst_13 = arith.constant 0.000000e+00 : f32
    %22 = vector.broadcast %cst_13 : f32 to vector<16x32xf32>
    %23 = arith.maximumf %21, %22 : vector<16x32xf32>
    %c64 = arith.constant 64 : index
    %c0_14 = arith.constant 0 : index
    %24 = vector.load %arg2[%c64, %c0_14] : memref<640x128xbf16, #tpu.memory_space<vmem>>, vector<32x32xbf16>
    %25 = arith.truncf %23 : vector<16x32xf32> to vector<16x32xbf16>
    %cst_15 = arith.constant dense<0.000000e+00> : vector<16x32xf32>
    %26 = tpu.matmul %25, %24, %cst_15 {dimension_numbers = #tpu.dot_dimension_numbers<[1], [0], [0], [1], [0, 0, 1, 1], [], []>} : vector<16x32xbf16>, vector<32x32xbf16>, vector<16x32xf32> -> vector<16x32xf32>
    %c259 = arith.constant 259 : index
    %c0_16 = arith.constant 0 : index
    %27 = vector.load %arg3[%c259, %c0_16] : memref<288x128xf32, #tpu.memory_space<vmem>>, vector<1x32xf32>
    %28 = vector.broadcast %27 : vector<1x32xf32> to vector<16x32xf32>
    %29 = arith.addf %26, %28 : vector<16x32xf32>
    %c0_17 = arith.constant 0 : index
    %c0_18 = arith.constant 0 : index
    %30 = vector.load %arg3[%c0_17, %c0_18] : memref<288x128xf32, #tpu.memory_space<vmem>>, vector<8x32xf32>
    %31 = vector.shape_cast %29 : vector<16x32xf32> to vector<2x8x32xf32>
    %32 = vector.shape_cast %30 : vector<8x32xf32> to vector<1x8x32xf32>
    %33 = vector.broadcast %32 : vector<1x8x32xf32> to vector<2x8x32xf32>
    %34 = arith.addf %31, %33 : vector<2x8x32xf32>
    %35 = vector.shape_cast %34 : vector<2x8x32xf32> to vector<16x32xf32>
    %c96 = arith.constant 96 : index
    %c0_19 = arith.constant 0 : index
    %36 = vector.load %arg2[%c96, %c0_19] : memref<640x128xbf16, #tpu.memory_space<vmem>>, vector<32x96xbf16>
    %37 = arith.truncf %35 : vector<16x32xf32> to vector<16x32xbf16>
    %cst_20 = arith.constant dense<0.000000e+00> : vector<16x96xf32>
    %38 = tpu.matmul %37, %36, %cst_20 {dimension_numbers = #tpu.dot_dimension_numbers<[1], [0], [0], [1], [0, 0, 1, 1], [], []>} : vector<16x32xbf16>, vector<32x96xbf16>, vector<16x96xf32> -> vector<16x96xf32>
    %c260 = arith.constant 260 : index
    %c0_21 = arith.constant 0 : index
    %39 = vector.load %arg3[%c260, %c0_21] : memref<288x128xf32, #tpu.memory_space<vmem>>, vector<1x96xf32>
    %40 = vector.broadcast %39 : vector<1x96xf32> to vector<16x96xf32>
    %41 = arith.addf %38, %40 : vector<16x96xf32>
    %42 = arith.truncf %41 : vector<16x96xf32> to vector<16x96xbf16>
    %43 = vector.extract_strided_slice %42 {offsets = [0, 0], sizes = [16, 8], strides = [1, 1]} : vector<16x96xbf16> to vector<16x8xbf16>
    %44 = vector.shape_cast %43 : vector<16x8xbf16> to vector<2x8x8xbf16>
    %45 = vector.extract_strided_slice %42 {offsets = [0, 32], sizes = [16, 8], strides = [1, 1]} : vector<16x96xbf16> to vector<16x8xbf16>
    %46 = vector.shape_cast %45 : vector<16x8xbf16> to vector<2x8x8xbf16>
    %47 = vector.extract_strided_slice %42 {offsets = [0, 64], sizes = [16, 8], strides = [1, 1]} : vector<16x96xbf16> to vector<16x8xbf16>
    %48 = vector.shape_cast %47 : vector<16x8xbf16> to vector<2x8x8xbf16>
    "tpu.trace_start"() <{level = 10 : i32, message = "nqd,nkd->nqk"}> : () -> ()
    %cst_22 = arith.constant dense<0.000000e+00> : vector<2x8x8xf32>
    %49 = tpu.matmul %44, %46, %cst_22 {dimension_numbers = #tpu.dot_dimension_numbers<[2], [2], [1], [1], [0, 0, 0, 1, 1, 1], [0], [0]>} : vector<2x8x8xbf16>, vector<2x8x8xbf16>, vector<2x8x8xf32> -> vector<2x8x8xf32>
    "tpu.trace_stop"() : () -> ()
    %cst_23 = arith.constant 0.353553385 : f32
    %50 = vector.broadcast %cst_23 : f32 to vector<2x8x8xf32>
    %51 = arith.mulf %49, %50 : vector<2x8x8xf32>
    %cst_24 = arith.constant dense<0xFF800000> : vector<2x8xf32>
    %52 = vector.multi_reduction <maximumf>, %51, %cst_24 [2] : vector<2x8x8xf32> to vector<2x8xf32>
    %53 = vector.shape_cast %52 : vector<2x8xf32> to vector<2x8x1xf32>
    %54 = vector.broadcast %53 : vector<2x8x1xf32> to vector<2x8x8xf32>
    %55 = arith.subf %51, %54 : vector<2x8x8xf32>
    %56 = math.exp %55 : vector<2x8x8xf32>
    %cst_25 = arith.constant dense<0.000000e+00> : vector<2x8xf32>
    %57 = vector.multi_reduction <add>, %56, %cst_25 [2] : vector<2x8x8xf32> to vector<2x8xf32>
    %58 = vector.shape_cast %57 : vector<2x8xf32> to vector<2x8x1xf32>
    %59 = tpu.reciprocal %58 {approx = true} : vector<2x8x1xf32> -> vector<2x8x1xf32>
    %60 = vector.broadcast %59 : vector<2x8x1xf32> to vector<2x8x8xf32>
    %61 = arith.mulf %56, %60 : vector<2x8x8xf32>
    %62 = arith.truncf %61 : vector<2x8x8xf32> to vector<2x8x8xbf16>
    "tpu.trace_start"() <{level = 10 : i32, message = "nqk,nkd->nqd"}> : () -> ()
    %cst_26 = arith.constant dense<0.000000e+00> : vector<2x8x8xf32>
    %63 = tpu.matmul %62, %48, %cst_26 {dimension_numbers = #tpu.dot_dimension_numbers<[2], [1], [1], [2], [0, 0, 0, 1, 1, 2], [0], [0]>} : vector<2x8x8xbf16>, vector<2x8x8xbf16>, vector<2x8x8xf32> -> vector<2x8x8xf32>
    "tpu.trace_stop"() : () -> ()
    %64 = vector.shape_cast %63 : vector<2x8x8xf32> to vector<16x8xf32>
    %65 = vector.extract_strided_slice %42 {offsets = [0, 8], sizes = [16, 8], strides = [1, 1]} : vector<16x96xbf16> to vector<16x8xbf16>
    %66 = vector.shape_cast %65 : vector<16x8xbf16> to vector<2x8x8xbf16>
    %67 = vector.extract_strided_slice %42 {offsets = [0, 40], sizes = [16, 8], strides = [1, 1]} : vector<16x96xbf16> to vector<16x8xbf16>
    %68 = vector.shape_cast %67 : vector<16x8xbf16> to vector<2x8x8xbf16>
    %69 = vector.extract_strided_slice %42 {offsets = [0, 72], sizes = [16, 8], strides = [1, 1]} : vector<16x96xbf16> to vector<16x8xbf16>
    %70 = vector.shape_cast %69 : vector<16x8xbf16> to vector<2x8x8xbf16>
    "tpu.trace_start"() <{level = 10 : i32, message = "nqd,nkd->nqk"}> : () -> ()
    %cst_27 = arith.constant dense<0.000000e+00> : vector<2x8x8xf32>
    %71 = tpu.matmul %66, %68, %cst_27 {dimension_numbers = #tpu.dot_dimension_numbers<[2], [2], [1], [1], [0, 0, 0, 1, 1, 1], [0], [0]>} : vector<2x8x8xbf16>, vector<2x8x8xbf16>, vector<2x8x8xf32> -> vector<2x8x8xf32>
    "tpu.trace_stop"() : () -> ()
    %cst_28 = arith.constant 0.353553385 : f32
    %72 = vector.broadcast %cst_28 : f32 to vector<2x8x8xf32>
    %73 = arith.mulf %71, %72 : vector<2x8x8xf32>
    %cst_29 = arith.constant dense<0xFF800000> : vector<2x8xf32>
    %74 = vector.multi_reduction <maximumf>, %73, %cst_29 [2] : vector<2x8x8xf32> to vector<2x8xf32>
    %75 = vector.shape_cast %74 : vector<2x8xf32> to vector<2x8x1xf32>
    %76 = vector.broadcast %75 : vector<2x8x1xf32> to vector<2x8x8xf32>
    %77 = arith.subf %73, %76 : vector<2x8x8xf32>
    %78 = math.exp %77 : vector<2x8x8xf32>
    %cst_30 = arith.constant dense<0.000000e+00> : vector<2x8xf32>
    %79 = vector.multi_reduction <add>, %78, %cst_30 [2] : vector<2x8x8xf32> to vector<2x8xf32>
    %80 = vector.shape_cast %79 : vector<2x8xf32> to vector<2x8x1xf32>
    %81 = tpu.reciprocal %80 {approx = true} : vector<2x8x1xf32> -> vector<2x8x1xf32>
    %82 = vector.broadcast %81 : vector<2x8x1xf32> to vector<2x8x8xf32>
    %83 = arith.mulf %78, %82 : vector<2x8x8xf32>
    %84 = arith.truncf %83 : vector<2x8x8xf32> to vector<2x8x8xbf16>
    "tpu.trace_start"() <{level = 10 : i32, message = "nqk,nkd->nqd"}> : () -> ()
    %cst_31 = arith.constant dense<0.000000e+00> : vector<2x8x8xf32>
    %85 = tpu.matmul %84, %70, %cst_31 {dimension_numbers = #tpu.dot_dimension_numbers<[2], [1], [1], [2], [0, 0, 0, 1, 1, 2], [0], [0]>} : vector<2x8x8xbf16>, vector<2x8x8xbf16>, vector<2x8x8xf32> -> vector<2x8x8xf32>
    "tpu.trace_stop"() : () -> ()
    %86 = vector.shape_cast %85 : vector<2x8x8xf32> to vector<16x8xf32>
    %87 = vector.extract_strided_slice %42 {offsets = [0, 16], sizes = [16, 8], strides = [1, 1]} : vector<16x96xbf16> to vector<16x8xbf16>
    %88 = vector.shape_cast %87 : vector<16x8xbf16> to vector<2x8x8xbf16>
    %89 = vector.extract_strided_slice %42 {offsets = [0, 48], sizes = [16, 8], strides = [1, 1]} : vector<16x96xbf16> to vector<16x8xbf16>
    %90 = vector.shape_cast %89 : vector<16x8xbf16> to vector<2x8x8xbf16>
    %91 = vector.extract_strided_slice %42 {offsets = [0, 80], sizes = [16, 8], strides = [1, 1]} : vector<16x96xbf16> to vector<16x8xbf16>
    %92 = vector.shape_cast %91 : vector<16x8xbf16> to vector<2x8x8xbf16>
    "tpu.trace_start"() <{level = 10 : i32, message = "nqd,nkd->nqk"}> : () -> ()
    %cst_32 = arith.constant dense<0.000000e+00> : vector<2x8x8xf32>
    %93 = tpu.matmul %88, %90, %cst_32 {dimension_numbers = #tpu.dot_dimension_numbers<[2], [2], [1], [1], [0, 0, 0, 1, 1, 1], [0], [0]>} : vector<2x8x8xbf16>, vector<2x8x8xbf16>, vector<2x8x8xf32> -> vector<2x8x8xf32>
    "tpu.trace_stop"() : () -> ()
    %cst_33 = arith.constant 0.353553385 : f32
    %94 = vector.broadcast %cst_33 : f32 to vector<2x8x8xf32>
    %95 = arith.mulf %93, %94 : vector<2x8x8xf32>
    %cst_34 = arith.constant dense<0xFF800000> : vector<2x8xf32>
    %96 = vector.multi_reduction <maximumf>, %95, %cst_34 [2] : vector<2x8x8xf32> to vector<2x8xf32>
    %97 = vector.shape_cast %96 : vector<2x8xf32> to vector<2x8x1xf32>
    %98 = vector.broadcast %97 : vector<2x8x1xf32> to vector<2x8x8xf32>
    %99 = arith.subf %95, %98 : vector<2x8x8xf32>
    %100 = math.exp %99 : vector<2x8x8xf32>
    %cst_35 = arith.constant dense<0.000000e+00> : vector<2x8xf32>
    %101 = vector.multi_reduction <add>, %100, %cst_35 [2] : vector<2x8x8xf32> to vector<2x8xf32>
    %102 = vector.shape_cast %101 : vector<2x8xf32> to vector<2x8x1xf32>
    %103 = tpu.reciprocal %102 {approx = true} : vector<2x8x1xf32> -> vector<2x8x1xf32>
    %104 = vector.broadcast %103 : vector<2x8x1xf32> to vector<2x8x8xf32>
    %105 = arith.mulf %100, %104 : vector<2x8x8xf32>
    %106 = arith.truncf %105 : vector<2x8x8xf32> to vector<2x8x8xbf16>
    "tpu.trace_start"() <{level = 10 : i32, message = "nqk,nkd->nqd"}> : () -> ()
    %cst_36 = arith.constant dense<0.000000e+00> : vector<2x8x8xf32>
    %107 = tpu.matmul %106, %92, %cst_36 {dimension_numbers = #tpu.dot_dimension_numbers<[2], [1], [1], [2], [0, 0, 0, 1, 1, 2], [0], [0]>} : vector<2x8x8xbf16>, vector<2x8x8xbf16>, vector<2x8x8xf32> -> vector<2x8x8xf32>
    "tpu.trace_stop"() : () -> ()
    %108 = vector.shape_cast %107 : vector<2x8x8xf32> to vector<16x8xf32>
    %109 = vector.extract_strided_slice %42 {offsets = [0, 24], sizes = [16, 8], strides = [1, 1]} : vector<16x96xbf16> to vector<16x8xbf16>
    %110 = vector.shape_cast %109 : vector<16x8xbf16> to vector<2x8x8xbf16>
    %111 = vector.extract_strided_slice %42 {offsets = [0, 56], sizes = [16, 8], strides = [1, 1]} : vector<16x96xbf16> to vector<16x8xbf16>
    %112 = vector.shape_cast %111 : vector<16x8xbf16> to vector<2x8x8xbf16>
    %113 = vector.extract_strided_slice %42 {offsets = [0, 88], sizes = [16, 8], strides = [1, 1]} : vector<16x96xbf16> to vector<16x8xbf16>
    %114 = vector.shape_cast %113 : vector<16x8xbf16> to vector<2x8x8xbf16>
    "tpu.trace_start"() <{level = 10 : i32, message = "nqd,nkd->nqk"}> : () -> ()
    %cst_37 = arith.constant dense<0.000000e+00> : vector<2x8x8xf32>
    %115 = tpu.matmul %110, %112, %cst_37 {dimension_numbers = #tpu.dot_dimension_numbers<[2], [2], [1], [1], [0, 0, 0, 1, 1, 1], [0], [0]>} : vector<2x8x8xbf16>, vector<2x8x8xbf16>, vector<2x8x8xf32> -> vector<2x8x8xf32>
    "tpu.trace_stop"() : () -> ()
    %cst_38 = arith.constant 0.353553385 : f32
    %116 = vector.broadcast %cst_38 : f32 to vector<2x8x8xf32>
    %117 = arith.mulf %115, %116 : vector<2x8x8xf32>
    %cst_39 = arith.constant dense<0xFF800000> : vector<2x8xf32>
    %118 = vector.multi_reduction <maximumf>, %117, %cst_39 [2] : vector<2x8x8xf32> to vector<2x8xf32>
    %119 = vector.shape_cast %118 : vector<2x8xf32> to vector<2x8x1xf32>
    %120 = vector.broadcast %119 : vector<2x8x1xf32> to vector<2x8x8xf32>
    %121 = arith.subf %117, %120 : vector<2x8x8xf32>
    %122 = math.exp %121 : vector<2x8x8xf32>
    %cst_40 = arith.constant dense<0.000000e+00> : vector<2x8xf32>
    %123 = vector.multi_reduction <add>, %122, %cst_40 [2] : vector<2x8x8xf32> to vector<2x8xf32>
    %124 = vector.shape_cast %123 : vector<2x8xf32> to vector<2x8x1xf32>
    %125 = tpu.reciprocal %124 {approx = true} : vector<2x8x1xf32> -> vector<2x8x1xf32>
    %126 = vector.broadcast %125 : vector<2x8x1xf32> to vector<2x8x8xf32>
    %127 = arith.mulf %122, %126 : vector<2x8x8xf32>
    %128 = arith.truncf %127 : vector<2x8x8xf32> to vector<2x8x8xbf16>
    "tpu.trace_start"() <{level = 10 : i32, message = "nqk,nkd->nqd"}> : () -> ()
    %cst_41 = arith.constant dense<0.000000e+00> : vector<2x8x8xf32>
    %129 = tpu.matmul %128, %114, %cst_41 {dimension_numbers = #tpu.dot_dimension_numbers<[2], [1], [1], [2], [0, 0, 0, 1, 1, 2], [0], [0]>} : vector<2x8x8xbf16>, vector<2x8x8xbf16>, vector<2x8x8xf32> -> vector<2x8x8xf32>
    "tpu.trace_stop"() : () -> ()
    %130 = vector.shape_cast %129 : vector<2x8x8xf32> to vector<16x8xf32>
    %131 = tpu.concatenate %64, %86, %108, %130 in 1 : vector<16x8xf32>, vector<16x8xf32>, vector<16x8xf32>, vector<16x8xf32> -> vector<16x32xf32>
    %c128 = arith.constant 128 : index
    %c0_42 = arith.constant 0 : index
    %132 = vector.load %arg2[%c128, %c0_42] : memref<640x128xbf16, #tpu.memory_space<vmem>>, vector<32x32xbf16>
    %133 = arith.truncf %131 : vector<16x32xf32> to vector<16x32xbf16>
    %cst_43 = arith.constant dense<0.000000e+00> : vector<16x32xf32>
    %134 = tpu.matmul %133, %132, %cst_43 {dimension_numbers = #tpu.dot_dimension_numbers<[1], [0], [0], [1], [0, 0, 1, 1], [], []>} : vector<16x32xbf16>, vector<32x32xbf16>, vector<16x32xf32> -> vector<16x32xf32>
    %c261 = arith.constant 261 : index
    %c0_44 = arith.constant 0 : index
    %135 = vector.load %arg3[%c261, %c0_44] : memref<288x128xf32, #tpu.memory_space<vmem>>, vector<1x32xf32>
    %136 = vector.broadcast %135 : vector<1x32xf32> to vector<16x32xf32>
    %137 = arith.addf %134, %136 : vector<16x32xf32>
    %138 = arith.addf %35, %137 : vector<16x32xf32>
    %cst_45 = arith.constant dense<0.000000e+00> : vector<16xf32>
    %139 = vector.multi_reduction <add>, %138, %cst_45 [1] : vector<16x32xf32> to vector<16xf32>
    %140 = vector.shape_cast %139 : vector<16xf32> to vector<16x1xf32>
    %cst_46 = arith.constant 3.200000e+01 : f32
    %141 = vector.broadcast %cst_46 : f32 to vector<16x1xf32>
    %142 = arith.divf %140, %141 : vector<16x1xf32>
    %143 = vector.broadcast %142 : vector<16x1xf32> to vector<16x32xf32>
    %144 = arith.subf %138, %143 : vector<16x32xf32>
    %145 = arith.mulf %144, %144 : vector<16x32xf32>
    %cst_47 = arith.constant dense<0.000000e+00> : vector<16xf32>
    %146 = vector.multi_reduction <add>, %145, %cst_47 [1] : vector<16x32xf32> to vector<16xf32>
    %147 = vector.shape_cast %146 : vector<16xf32> to vector<16x1xf32>
    %cst_48 = arith.constant 3.200000e+01 : f32
    %148 = vector.broadcast %cst_48 : f32 to vector<16x1xf32>
    %149 = arith.divf %147, %148 : vector<16x1xf32>
    %cst_49 = arith.constant 9.99999974E-6 : f32
    %150 = vector.broadcast %cst_49 : f32 to vector<16x1xf32>
    %151 = arith.addf %149, %150 : vector<16x1xf32>
    %152 = math.rsqrt %151 : vector<16x1xf32>
    %153 = vector.broadcast %152 : vector<16x1xf32> to vector<16x32xf32>
    %154 = arith.mulf %144, %153 : vector<16x32xf32>
    %c262 = arith.constant 262 : index
    %c0_50 = arith.constant 0 : index
    %155 = vector.load %arg3[%c262, %c0_50] : memref<288x128xf32, #tpu.memory_space<vmem>>, vector<1x32xf32>
    %156 = vector.broadcast %155 : vector<1x32xf32> to vector<16x32xf32>
    %157 = arith.mulf %154, %156 : vector<16x32xf32>
    %c263 = arith.constant 263 : index
    %c0_51 = arith.constant 0 : index
    %158 = vector.load %arg3[%c263, %c0_51] : memref<288x128xf32, #tpu.memory_space<vmem>>, vector<1x32xf32>
    %159 = vector.broadcast %158 : vector<1x32xf32> to vector<16x32xf32>
    %160 = arith.addf %157, %159 : vector<16x32xf32>
    %c160 = arith.constant 160 : index
    %c0_52 = arith.constant 0 : index
    %161 = vector.load %arg2[%c160, %c0_52] : memref<640x128xbf16, #tpu.memory_space<vmem>>, vector<32x128xbf16>
    %162 = arith.truncf %160 : vector<16x32xf32> to vector<16x32xbf16>
    %cst_53 = arith.constant dense<0.000000e+00> : vector<16x128xf32>
    %163 = tpu.matmul %162, %161, %cst_53 {dimension_numbers = #tpu.dot_dimension_numbers<[1], [0], [0], [1], [0, 0, 1, 1], [], []>} : vector<16x32xbf16>, vector<32x128xbf16>, vector<16x128xf32> -> vector<16x128xf32>
    %c264 = arith.constant 264 : index
    %c0_54 = arith.constant 0 : index
    %164 = vector.load %arg3[%c264, %c0_54] : memref<288x128xf32, #tpu.memory_space<vmem>>, vector<1x128xf32>
    %165 = vector.broadcast %164 : vector<1x128xf32> to vector<16x128xf32>
    %166 = arith.addf %163, %165 : vector<16x128xf32>
    %cst_55 = arith.constant 0.000000e+00 : f32
    %167 = vector.broadcast %cst_55 : f32 to vector<16x128xf32>
    %168 = arith.maximumf %166, %167 : vector<16x128xf32>
    %c192 = arith.constant 192 : index
    %c0_56 = arith.constant 0 : index
    %169 = vector.load %arg2[%c192, %c0_56] : memref<640x128xbf16, #tpu.memory_space<vmem>>, vector<128x32xbf16>
    %170 = arith.truncf %168 : vector<16x128xf32> to vector<16x128xbf16>
    %cst_57 = arith.constant dense<0.000000e+00> : vector<16x32xf32>
    %171 = tpu.matmul %170, %169, %cst_57 {dimension_numbers = #tpu.dot_dimension_numbers<[1], [0], [0], [1], [0, 0, 1, 1], [], []>} : vector<16x128xbf16>, vector<128x32xbf16>, vector<16x32xf32> -> vector<16x32xf32>
    %c265 = arith.constant 265 : index
    %c0_58 = arith.constant 0 : index
    %172 = vector.load %arg3[%c265, %c0_58] : memref<288x128xf32, #tpu.memory_space<vmem>>, vector<1x32xf32>
    %173 = vector.broadcast %172 : vector<1x32xf32> to vector<16x32xf32>
    %174 = arith.addf %171, %173 : vector<16x32xf32>
    %175 = arith.addf %160, %174 : vector<16x32xf32>
    %cst_59 = arith.constant dense<0.000000e+00> : vector<16xf32>
    %176 = vector.multi_reduction <add>, %175, %cst_59 [1] : vector<16x32xf32> to vector<16xf32>
    %177 = vector.shape_cast %176 : vector<16xf32> to vector<16x1xf32>
    %cst_60 = arith.constant 3.200000e+01 : f32
    %178 = vector.broadcast %cst_60 : f32 to vector<16x1xf32>
    %179 = arith.divf %177, %178 : vector<16x1xf32>
    %180 = vector.broadcast %179 : vector<16x1xf32> to vector<16x32xf32>
    %181 = arith.subf %175, %180 : vector<16x32xf32>
    %182 = arith.mulf %181, %181 : vector<16x32xf32>
    %cst_61 = arith.constant dense<0.000000e+00> : vector<16xf32>
    %183 = vector.multi_reduction <add>, %182, %cst_61 [1] : vector<16x32xf32> to vector<16xf32>
    %184 = vector.shape_cast %183 : vector<16xf32> to vector<16x1xf32>
    %cst_62 = arith.constant 3.200000e+01 : f32
    %185 = vector.broadcast %cst_62 : f32 to vector<16x1xf32>
    %186 = arith.divf %184, %185 : vector<16x1xf32>
    %cst_63 = arith.constant 9.99999974E-6 : f32
    %187 = vector.broadcast %cst_63 : f32 to vector<16x1xf32>
    %188 = arith.addf %186, %187 : vector<16x1xf32>
    %189 = math.rsqrt %188 : vector<16x1xf32>
    %190 = vector.broadcast %189 : vector<16x1xf32> to vector<16x32xf32>
    %191 = arith.mulf %181, %190 : vector<16x32xf32>
    %c266 = arith.constant 266 : index
    %c0_64 = arith.constant 0 : index
    %192 = vector.load %arg3[%c266, %c0_64] : memref<288x128xf32, #tpu.memory_space<vmem>>, vector<1x32xf32>
    %193 = vector.broadcast %192 : vector<1x32xf32> to vector<16x32xf32>
    %194 = arith.mulf %191, %193 : vector<16x32xf32>
    %c267 = arith.constant 267 : index
    %c0_65 = arith.constant 0 : index
    %195 = vector.load %arg3[%c267, %c0_65] : memref<288x128xf32, #tpu.memory_space<vmem>>, vector<1x32xf32>
    %196 = vector.broadcast %195 : vector<1x32xf32> to vector<16x32xf32>
    %197 = arith.addf %194, %196 : vector<16x32xf32>
    %c320 = arith.constant 320 : index
    %c0_66 = arith.constant 0 : index
    %198 = vector.load %arg2[%c320, %c0_66] : memref<640x128xbf16, #tpu.memory_space<vmem>>, vector<32x96xbf16>
    %199 = arith.truncf %197 : vector<16x32xf32> to vector<16x32xbf16>
    %cst_67 = arith.constant dense<0.000000e+00> : vector<16x96xf32>
    %200 = tpu.matmul %199, %198, %cst_67 {dimension_numbers = #tpu.dot_dimension_numbers<[1], [0], [0], [1], [0, 0, 1, 1], [], []>} : vector<16x32xbf16>, vector<32x96xbf16>, vector<16x96xf32> -> vector<16x96xf32>
    %c268 = arith.constant 268 : index
    %c0_68 = arith.constant 0 : index
    %201 = vector.load %arg3[%c268, %c0_68] : memref<288x128xf32, #tpu.memory_space<vmem>>, vector<1x96xf32>
    %202 = vector.broadcast %201 : vector<1x96xf32> to vector<16x96xf32>
    %203 = arith.addf %200, %202 : vector<16x96xf32>
    %204 = arith.truncf %203 : vector<16x96xf32> to vector<16x96xbf16>
    %205 = vector.extract_strided_slice %204 {offsets = [0, 0], sizes = [16, 8], strides = [1, 1]} : vector<16x96xbf16> to vector<16x8xbf16>
    %206 = vector.shape_cast %205 : vector<16x8xbf16> to vector<2x8x8xbf16>
    %207 = vector.extract_strided_slice %204 {offsets = [0, 32], sizes = [16, 8], strides = [1, 1]} : vector<16x96xbf16> to vector<16x8xbf16>
    %208 = vector.shape_cast %207 : vector<16x8xbf16> to vector<2x8x8xbf16>
    %209 = vector.extract_strided_slice %204 {offsets = [0, 64], sizes = [16, 8], strides = [1, 1]} : vector<16x96xbf16> to vector<16x8xbf16>
    %210 = vector.shape_cast %209 : vector<16x8xbf16> to vector<2x8x8xbf16>
    "tpu.trace_start"() <{level = 10 : i32, message = "nqd,nkd->nqk"}> : () -> ()
    %cst_69 = arith.constant dense<0.000000e+00> : vector<2x8x8xf32>
    %211 = tpu.matmul %206, %208, %cst_69 {dimension_numbers = #tpu.dot_dimension_numbers<[2], [2], [1], [1], [0, 0, 0, 1, 1, 1], [0], [0]>} : vector<2x8x8xbf16>, vector<2x8x8xbf16>, vector<2x8x8xf32> -> vector<2x8x8xf32>
    "tpu.trace_stop"() : () -> ()
    %cst_70 = arith.constant 0.353553385 : f32
    %212 = vector.broadcast %cst_70 : f32 to vector<2x8x8xf32>
    %213 = arith.mulf %211, %212 : vector<2x8x8xf32>
    %cst_71 = arith.constant dense<0xFF800000> : vector<2x8xf32>
    %214 = vector.multi_reduction <maximumf>, %213, %cst_71 [2] : vector<2x8x8xf32> to vector<2x8xf32>
    %215 = vector.shape_cast %214 : vector<2x8xf32> to vector<2x8x1xf32>
    %216 = vector.broadcast %215 : vector<2x8x1xf32> to vector<2x8x8xf32>
    %217 = arith.subf %213, %216 : vector<2x8x8xf32>
    %218 = math.exp %217 : vector<2x8x8xf32>
    %cst_72 = arith.constant dense<0.000000e+00> : vector<2x8xf32>
    %219 = vector.multi_reduction <add>, %218, %cst_72 [2] : vector<2x8x8xf32> to vector<2x8xf32>
    %220 = vector.shape_cast %219 : vector<2x8xf32> to vector<2x8x1xf32>
    %221 = tpu.reciprocal %220 {approx = true} : vector<2x8x1xf32> -> vector<2x8x1xf32>
    %222 = vector.broadcast %221 : vector<2x8x1xf32> to vector<2x8x8xf32>
    %223 = arith.mulf %218, %222 : vector<2x8x8xf32>
    %224 = arith.truncf %223 : vector<2x8x8xf32> to vector<2x8x8xbf16>
    "tpu.trace_start"() <{level = 10 : i32, message = "nqk,nkd->nqd"}> : () -> ()
    %cst_73 = arith.constant dense<0.000000e+00> : vector<2x8x8xf32>
    %225 = tpu.matmul %224, %210, %cst_73 {dimension_numbers = #tpu.dot_dimension_numbers<[2], [1], [1], [2], [0, 0, 0, 1, 1, 2], [0], [0]>} : vector<2x8x8xbf16>, vector<2x8x8xbf16>, vector<2x8x8xf32> -> vector<2x8x8xf32>
    "tpu.trace_stop"() : () -> ()
    %226 = vector.shape_cast %225 : vector<2x8x8xf32> to vector<16x8xf32>
    %227 = vector.extract_strided_slice %204 {offsets = [0, 8], sizes = [16, 8], strides = [1, 1]} : vector<16x96xbf16> to vector<16x8xbf16>
    %228 = vector.shape_cast %227 : vector<16x8xbf16> to vector<2x8x8xbf16>
    %229 = vector.extract_strided_slice %204 {offsets = [0, 40], sizes = [16, 8], strides = [1, 1]} : vector<16x96xbf16> to vector<16x8xbf16>
    %230 = vector.shape_cast %229 : vector<16x8xbf16> to vector<2x8x8xbf16>
    %231 = vector.extract_strided_slice %204 {offsets = [0, 72], sizes = [16, 8], strides = [1, 1]} : vector<16x96xbf16> to vector<16x8xbf16>
    %232 = vector.shape_cast %231 : vector<16x8xbf16> to vector<2x8x8xbf16>
    "tpu.trace_start"() <{level = 10 : i32, message = "nqd,nkd->nqk"}> : () -> ()
    %cst_74 = arith.constant dense<0.000000e+00> : vector<2x8x8xf32>
    %233 = tpu.matmul %228, %230, %cst_74 {dimension_numbers = #tpu.dot_dimension_numbers<[2], [2], [1], [1], [0, 0, 0, 1, 1, 1], [0], [0]>} : vector<2x8x8xbf16>, vector<2x8x8xbf16>, vector<2x8x8xf32> -> vector<2x8x8xf32>
    "tpu.trace_stop"() : () -> ()
    %cst_75 = arith.constant 0.353553385 : f32
    %234 = vector.broadcast %cst_75 : f32 to vector<2x8x8xf32>
    %235 = arith.mulf %233, %234 : vector<2x8x8xf32>
    %cst_76 = arith.constant dense<0xFF800000> : vector<2x8xf32>
    %236 = vector.multi_reduction <maximumf>, %235, %cst_76 [2] : vector<2x8x8xf32> to vector<2x8xf32>
    %237 = vector.shape_cast %236 : vector<2x8xf32> to vector<2x8x1xf32>
    %238 = vector.broadcast %237 : vector<2x8x1xf32> to vector<2x8x8xf32>
    %239 = arith.subf %235, %238 : vector<2x8x8xf32>
    %240 = math.exp %239 : vector<2x8x8xf32>
    %cst_77 = arith.constant dense<0.000000e+00> : vector<2x8xf32>
    %241 = vector.multi_reduction <add>, %240, %cst_77 [2] : vector<2x8x8xf32> to vector<2x8xf32>
    %242 = vector.shape_cast %241 : vector<2x8xf32> to vector<2x8x1xf32>
    %243 = tpu.reciprocal %242 {approx = true} : vector<2x8x1xf32> -> vector<2x8x1xf32>
    %244 = vector.broadcast %243 : vector<2x8x1xf32> to vector<2x8x8xf32>
    %245 = arith.mulf %240, %244 : vector<2x8x8xf32>
    %246 = arith.truncf %245 : vector<2x8x8xf32> to vector<2x8x8xbf16>
    "tpu.trace_start"() <{level = 10 : i32, message = "nqk,nkd->nqd"}> : () -> ()
    %cst_78 = arith.constant dense<0.000000e+00> : vector<2x8x8xf32>
    %247 = tpu.matmul %246, %232, %cst_78 {dimension_numbers = #tpu.dot_dimension_numbers<[2], [1], [1], [2], [0, 0, 0, 1, 1, 2], [0], [0]>} : vector<2x8x8xbf16>, vector<2x8x8xbf16>, vector<2x8x8xf32> -> vector<2x8x8xf32>
    "tpu.trace_stop"() : () -> ()
    %248 = vector.shape_cast %247 : vector<2x8x8xf32> to vector<16x8xf32>
    %249 = vector.extract_strided_slice %204 {offsets = [0, 16], sizes = [16, 8], strides = [1, 1]} : vector<16x96xbf16> to vector<16x8xbf16>
    %250 = vector.shape_cast %249 : vector<16x8xbf16> to vector<2x8x8xbf16>
    %251 = vector.extract_strided_slice %204 {offsets = [0, 48], sizes = [16, 8], strides = [1, 1]} : vector<16x96xbf16> to vector<16x8xbf16>
    %252 = vector.shape_cast %251 : vector<16x8xbf16> to vector<2x8x8xbf16>
    %253 = vector.extract_strided_slice %204 {offsets = [0, 80], sizes = [16, 8], strides = [1, 1]} : vector<16x96xbf16> to vector<16x8xbf16>
    %254 = vector.shape_cast %253 : vector<16x8xbf16> to vector<2x8x8xbf16>
    "tpu.trace_start"() <{level = 10 : i32, message = "nqd,nkd->nqk"}> : () -> ()
    %cst_79 = arith.constant dense<0.000000e+00> : vector<2x8x8xf32>
    %255 = tpu.matmul %250, %252, %cst_79 {dimension_numbers = #tpu.dot_dimension_numbers<[2], [2], [1], [1], [0, 0, 0, 1, 1, 1], [0], [0]>} : vector<2x8x8xbf16>, vector<2x8x8xbf16>, vector<2x8x8xf32> -> vector<2x8x8xf32>
    "tpu.trace_stop"() : () -> ()
    %cst_80 = arith.constant 0.353553385 : f32
    %256 = vector.broadcast %cst_80 : f32 to vector<2x8x8xf32>
    %257 = arith.mulf %255, %256 : vector<2x8x8xf32>
    %cst_81 = arith.constant dense<0xFF800000> : vector<2x8xf32>
    %258 = vector.multi_reduction <maximumf>, %257, %cst_81 [2] : vector<2x8x8xf32> to vector<2x8xf32>
    %259 = vector.shape_cast %258 : vector<2x8xf32> to vector<2x8x1xf32>
    %260 = vector.broadcast %259 : vector<2x8x1xf32> to vector<2x8x8xf32>
    %261 = arith.subf %257, %260 : vector<2x8x8xf32>
    %262 = math.exp %261 : vector<2x8x8xf32>
    %cst_82 = arith.constant dense<0.000000e+00> : vector<2x8xf32>
    %263 = vector.multi_reduction <add>, %262, %cst_82 [2] : vector<2x8x8xf32> to vector<2x8xf32>
    %264 = vector.shape_cast %263 : vector<2x8xf32> to vector<2x8x1xf32>
    %265 = tpu.reciprocal %264 {approx = true} : vector<2x8x1xf32> -> vector<2x8x1xf32>
    %266 = vector.broadcast %265 : vector<2x8x1xf32> to vector<2x8x8xf32>
    %267 = arith.mulf %262, %266 : vector<2x8x8xf32>
    %268 = arith.truncf %267 : vector<2x8x8xf32> to vector<2x8x8xbf16>
    "tpu.trace_start"() <{level = 10 : i32, message = "nqk,nkd->nqd"}> : () -> ()
    %cst_83 = arith.constant dense<0.000000e+00> : vector<2x8x8xf32>
    %269 = tpu.matmul %268, %254, %cst_83 {dimension_numbers = #tpu.dot_dimension_numbers<[2], [1], [1], [2], [0, 0, 0, 1, 1, 2], [0], [0]>} : vector<2x8x8xbf16>, vector<2x8x8xbf16>, vector<2x8x8xf32> -> vector<2x8x8xf32>
    "tpu.trace_stop"() : () -> ()
    %270 = vector.shape_cast %269 : vector<2x8x8xf32> to vector<16x8xf32>
    %271 = vector.extract_strided_slice %204 {offsets = [0, 24], sizes = [16, 8], strides = [1, 1]} : vector<16x96xbf16> to vector<16x8xbf16>
    %272 = vector.shape_cast %271 : vector<16x8xbf16> to vector<2x8x8xbf16>
    %273 = vector.extract_strided_slice %204 {offsets = [0, 56], sizes = [16, 8], strides = [1, 1]} : vector<16x96xbf16> to vector<16x8xbf16>
    %274 = vector.shape_cast %273 : vector<16x8xbf16> to vector<2x8x8xbf16>
    %275 = vector.extract_strided_slice %204 {offsets = [0, 88], sizes = [16, 8], strides = [1, 1]} : vector<16x96xbf16> to vector<16x8xbf16>
    %276 = vector.shape_cast %275 : vector<16x8xbf16> to vector<2x8x8xbf16>
    "tpu.trace_start"() <{level = 10 : i32, message = "nqd,nkd->nqk"}> : () -> ()
    %cst_84 = arith.constant dense<0.000000e+00> : vector<2x8x8xf32>
    %277 = tpu.matmul %272, %274, %cst_84 {dimension_numbers = #tpu.dot_dimension_numbers<[2], [2], [1], [1], [0, 0, 0, 1, 1, 1], [0], [0]>} : vector<2x8x8xbf16>, vector<2x8x8xbf16>, vector<2x8x8xf32> -> vector<2x8x8xf32>
    "tpu.trace_stop"() : () -> ()
    %cst_85 = arith.constant 0.353553385 : f32
    %278 = vector.broadcast %cst_85 : f32 to vector<2x8x8xf32>
    %279 = arith.mulf %277, %278 : vector<2x8x8xf32>
    %cst_86 = arith.constant dense<0xFF800000> : vector<2x8xf32>
    %280 = vector.multi_reduction <maximumf>, %279, %cst_86 [2] : vector<2x8x8xf32> to vector<2x8xf32>
    %281 = vector.shape_cast %280 : vector<2x8xf32> to vector<2x8x1xf32>
    %282 = vector.broadcast %281 : vector<2x8x1xf32> to vector<2x8x8xf32>
    %283 = arith.subf %279, %282 : vector<2x8x8xf32>
    %284 = math.exp %283 : vector<2x8x8xf32>
    %cst_87 = arith.constant dense<0.000000e+00> : vector<2x8xf32>
    %285 = vector.multi_reduction <add>, %284, %cst_87 [2] : vector<2x8x8xf32> to vector<2x8xf32>
    %286 = vector.shape_cast %285 : vector<2x8xf32> to vector<2x8x1xf32>
    %287 = tpu.reciprocal %286 {approx = true} : vector<2x8x1xf32> -> vector<2x8x1xf32>
    %288 = vector.broadcast %287 : vector<2x8x1xf32> to vector<2x8x8xf32>
    %289 = arith.mulf %284, %288 : vector<2x8x8xf32>
    %290 = arith.truncf %289 : vector<2x8x8xf32> to vector<2x8x8xbf16>
    "tpu.trace_start"() <{level = 10 : i32, message = "nqk,nkd->nqd"}> : () -> ()
    %cst_88 = arith.constant dense<0.000000e+00> : vector<2x8x8xf32>
    %291 = tpu.matmul %290, %276, %cst_88 {dimension_numbers = #tpu.dot_dimension_numbers<[2], [1], [1], [2], [0, 0, 0, 1, 1, 2], [0], [0]>} : vector<2x8x8xbf16>, vector<2x8x8xbf16>, vector<2x8x8xf32> -> vector<2x8x8xf32>
    "tpu.trace_stop"() : () -> ()
    %292 = vector.shape_cast %291 : vector<2x8x8xf32> to vector<16x8xf32>
    %293 = tpu.concatenate %226, %248, %270, %292 in 1 : vector<16x8xf32>, vector<16x8xf32>, vector<16x8xf32>, vector<16x8xf32> -> vector<16x32xf32>
    %c352 = arith.constant 352 : index
    %c0_89 = arith.constant 0 : index
    %294 = vector.load %arg2[%c352, %c0_89] : memref<640x128xbf16, #tpu.memory_space<vmem>>, vector<32x32xbf16>
    %295 = arith.truncf %293 : vector<16x32xf32> to vector<16x32xbf16>
    %cst_90 = arith.constant dense<0.000000e+00> : vector<16x32xf32>
    %296 = tpu.matmul %295, %294, %cst_90 {dimension_numbers = #tpu.dot_dimension_numbers<[1], [0], [0], [1], [0, 0, 1, 1], [], []>} : vector<16x32xbf16>, vector<32x32xbf16>, vector<16x32xf32> -> vector<16x32xf32>
    %c269 = arith.constant 269 : index
    %c0_91 = arith.constant 0 : index
    %297 = vector.load %arg3[%c269, %c0_91] : memref<288x128xf32, #tpu.memory_space<vmem>>, vector<1x32xf32>
    %298 = vector.broadcast %297 : vector<1x32xf32> to vector<16x32xf32>
    %299 = arith.addf %296, %298 : vector<16x32xf32>
    %300 = arith.addf %197, %299 : vector<16x32xf32>
    %cst_92 = arith.constant dense<0.000000e+00> : vector<16xf32>
    %301 = vector.multi_reduction <add>, %300, %cst_92 [1] : vector<16x32xf32> to vector<16xf32>
    %302 = vector.shape_cast %301 : vector<16xf32> to vector<16x1xf32>
    %cst_93 = arith.constant 3.200000e+01 : f32
    %303 = vector.broadcast %cst_93 : f32 to vector<16x1xf32>
    %304 = arith.divf %302, %303 : vector<16x1xf32>
    %305 = vector.broadcast %304 : vector<16x1xf32> to vector<16x32xf32>
    %306 = arith.subf %300, %305 : vector<16x32xf32>
    %307 = arith.mulf %306, %306 : vector<16x32xf32>
    %cst_94 = arith.constant dense<0.000000e+00> : vector<16xf32>
    %308 = vector.multi_reduction <add>, %307, %cst_94 [1] : vector<16x32xf32> to vector<16xf32>
    %309 = vector.shape_cast %308 : vector<16xf32> to vector<16x1xf32>
    %cst_95 = arith.constant 3.200000e+01 : f32
    %310 = vector.broadcast %cst_95 : f32 to vector<16x1xf32>
    %311 = arith.divf %309, %310 : vector<16x1xf32>
    %cst_96 = arith.constant 9.99999974E-6 : f32
    %312 = vector.broadcast %cst_96 : f32 to vector<16x1xf32>
    %313 = arith.addf %311, %312 : vector<16x1xf32>
    %314 = math.rsqrt %313 : vector<16x1xf32>
    %315 = vector.broadcast %314 : vector<16x1xf32> to vector<16x32xf32>
    %316 = arith.mulf %306, %315 : vector<16x32xf32>
    %c270 = arith.constant 270 : index
    %c0_97 = arith.constant 0 : index
    %317 = vector.load %arg3[%c270, %c0_97] : memref<288x128xf32, #tpu.memory_space<vmem>>, vector<1x32xf32>
    %318 = vector.broadcast %317 : vector<1x32xf32> to vector<16x32xf32>
    %319 = arith.mulf %316, %318 : vector<16x32xf32>
    %c271 = arith.constant 271 : index
    %c0_98 = arith.constant 0 : index
    %320 = vector.load %arg3[%c271, %c0_98] : memref<288x128xf32, #tpu.memory_space<vmem>>, vector<1x32xf32>
    %321 = vector.broadcast %320 : vector<1x32xf32> to vector<16x32xf32>
    %322 = arith.addf %319, %321 : vector<16x32xf32>
    %c384 = arith.constant 384 : index
    %c0_99 = arith.constant 0 : index
    %323 = vector.load %arg2[%c384, %c0_99] : memref<640x128xbf16, #tpu.memory_space<vmem>>, vector<32x128xbf16>
    %324 = arith.truncf %322 : vector<16x32xf32> to vector<16x32xbf16>
    %cst_100 = arith.constant dense<0.000000e+00> : vector<16x128xf32>
    %325 = tpu.matmul %324, %323, %cst_100 {dimension_numbers = #tpu.dot_dimension_numbers<[1], [0], [0], [1], [0, 0, 1, 1], [], []>} : vector<16x32xbf16>, vector<32x128xbf16>, vector<16x128xf32> -> vector<16x128xf32>
    %c272 = arith.constant 272 : index
    %c0_101 = arith.constant 0 : index
    %326 = vector.load %arg3[%c272, %c0_101] : memref<288x128xf32, #tpu.memory_space<vmem>>, vector<1x128xf32>
    %327 = vector.broadcast %326 : vector<1x128xf32> to vector<16x128xf32>
    %328 = arith.addf %325, %327 : vector<16x128xf32>
    %cst_102 = arith.constant 0.000000e+00 : f32
    %329 = vector.broadcast %cst_102 : f32 to vector<16x128xf32>
    %330 = arith.maximumf %328, %329 : vector<16x128xf32>
    %c416 = arith.constant 416 : index
    %c0_103 = arith.constant 0 : index
    %331 = vector.load %arg2[%c416, %c0_103] : memref<640x128xbf16, #tpu.memory_space<vmem>>, vector<128x32xbf16>
    %332 = arith.truncf %330 : vector<16x128xf32> to vector<16x128xbf16>
    %cst_104 = arith.constant dense<0.000000e+00> : vector<16x32xf32>
    %333 = tpu.matmul %332, %331, %cst_104 {dimension_numbers = #tpu.dot_dimension_numbers<[1], [0], [0], [1], [0, 0, 1, 1], [], []>} : vector<16x128xbf16>, vector<128x32xbf16>, vector<16x32xf32> -> vector<16x32xf32>
    %c273 = arith.constant 273 : index
    %c0_105 = arith.constant 0 : index
    %334 = vector.load %arg3[%c273, %c0_105] : memref<288x128xf32, #tpu.memory_space<vmem>>, vector<1x32xf32>
    %335 = vector.broadcast %334 : vector<1x32xf32> to vector<16x32xf32>
    %336 = arith.addf %333, %335 : vector<16x32xf32>
    %337 = arith.addf %322, %336 : vector<16x32xf32>
    %cst_106 = arith.constant dense<0.000000e+00> : vector<16xf32>
    %338 = vector.multi_reduction <add>, %337, %cst_106 [1] : vector<16x32xf32> to vector<16xf32>
    %339 = vector.shape_cast %338 : vector<16xf32> to vector<16x1xf32>
    %cst_107 = arith.constant 3.200000e+01 : f32
    %340 = vector.broadcast %cst_107 : f32 to vector<16x1xf32>
    %341 = arith.divf %339, %340 : vector<16x1xf32>
    %342 = vector.broadcast %341 : vector<16x1xf32> to vector<16x32xf32>
    %343 = arith.subf %337, %342 : vector<16x32xf32>
    %344 = arith.mulf %343, %343 : vector<16x32xf32>
    %cst_108 = arith.constant dense<0.000000e+00> : vector<16xf32>
    %345 = vector.multi_reduction <add>, %344, %cst_108 [1] : vector<16x32xf32> to vector<16xf32>
    %346 = vector.shape_cast %345 : vector<16xf32> to vector<16x1xf32>
    %cst_109 = arith.constant 3.200000e+01 : f32
    %347 = vector.broadcast %cst_109 : f32 to vector<16x1xf32>
    %348 = arith.divf %346, %347 : vector<16x1xf32>
    %cst_110 = arith.constant 9.99999974E-6 : f32
    %349 = vector.broadcast %cst_110 : f32 to vector<16x1xf32>
    %350 = arith.addf %348, %349 : vector<16x1xf32>
    %351 = math.rsqrt %350 : vector<16x1xf32>
    %352 = vector.broadcast %351 : vector<16x1xf32> to vector<16x32xf32>
    %353 = arith.mulf %343, %352 : vector<16x32xf32>
    %c274 = arith.constant 274 : index
    %c0_111 = arith.constant 0 : index
    %354 = vector.load %arg3[%c274, %c0_111] : memref<288x128xf32, #tpu.memory_space<vmem>>, vector<1x32xf32>
    %355 = vector.broadcast %354 : vector<1x32xf32> to vector<16x32xf32>
    %356 = arith.mulf %353, %355 : vector<16x32xf32>
    %c275 = arith.constant 275 : index
    %c0_112 = arith.constant 0 : index
    %357 = vector.load %arg3[%c275, %c0_112] : memref<288x128xf32, #tpu.memory_space<vmem>>, vector<1x32xf32>
    %358 = vector.broadcast %357 : vector<1x32xf32> to vector<16x32xf32>
    %359 = arith.addf %356, %358 : vector<16x32xf32>
    %360 = vector.shape_cast %359 : vector<16x32xf32> to vector<2x8x32xf32>
    %361 = vector.extract_strided_slice %360 {offsets = [0, 7, 0], sizes = [2, 1, 32], strides = [1, 1, 1]} : vector<2x8x32xf32> to vector<2x1x32xf32>
    %362 = vector.shape_cast %361 : vector<2x1x32xf32> to vector<2x32xf32>
    %cst_113 = arith.constant dense<0.000000e+00> : vector<2xf32>
    %363 = vector.multi_reduction <add>, %14, %cst_113 [1] : vector<2x32xf32> to vector<2xf32>
    %364 = vector.shape_cast %363 : vector<2xf32> to vector<2x1xf32>
    %cst_114 = arith.constant dense<0.000000e+00> : vector<2xf32>
    %365 = vector.multi_reduction <add>, %362, %cst_114 [1] : vector<2x32xf32> to vector<2xf32>
    %366 = vector.shape_cast %365 : vector<2xf32> to vector<2x1xf32>
    %367 = arith.addf %364, %366 : vector<2x1xf32>
    %cst_115 = arith.constant 6.400000e+01 : f32
    %368 = vector.broadcast %cst_115 : f32 to vector<2x1xf32>
    %369 = arith.divf %367, %368 : vector<2x1xf32>
    %370 = vector.broadcast %369 : vector<2x1xf32> to vector<2x32xf32>
    %371 = arith.subf %14, %370 : vector<2x32xf32>
    %372 = vector.broadcast %369 : vector<2x1xf32> to vector<2x32xf32>
    %373 = arith.subf %362, %372 : vector<2x32xf32>
    %374 = arith.mulf %371, %371 : vector<2x32xf32>
    %cst_116 = arith.constant dense<0.000000e+00> : vector<2xf32>
    %375 = vector.multi_reduction <add>, %374, %cst_116 [1] : vector<2x32xf32> to vector<2xf32>
    %376 = vector.shape_cast %375 : vector<2xf32> to vector<2x1xf32>
    %377 = arith.mulf %373, %373 : vector<2x32xf32>
    %cst_117 = arith.constant dense<0.000000e+00> : vector<2xf32>
    %378 = vector.multi_reduction <add>, %377, %cst_117 [1] : vector<2x32xf32> to vector<2xf32>
    %379 = vector.shape_cast %378 : vector<2xf32> to vector<2x1xf32>
    %380 = arith.addf %376, %379 : vector<2x1xf32>
    %cst_118 = arith.constant 6.400000e+01 : f32
    %381 = vector.broadcast %cst_118 : f32 to vector<2x1xf32>
    %382 = arith.divf %380, %381 : vector<2x1xf32>
    %cst_119 = arith.constant 9.99999974E-6 : f32
    %383 = vector.broadcast %cst_119 : f32 to vector<2x1xf32>
    %384 = arith.addf %382, %383 : vector<2x1xf32>
    %385 = math.rsqrt %384 : vector<2x1xf32>
    %386 = vector.broadcast %385 : vector<2x1xf32> to vector<2x32xf32>
    %387 = arith.mulf %371, %386 : vector<2x32xf32>
    %c276 = arith.constant 276 : index
    %c0_120 = arith.constant 0 : index
    %388 = vector.load %arg3[%c276, %c0_120] : memref<288x128xf32, #tpu.memory_space<vmem>>, vector<1x32xf32>
    %389 = vector.broadcast %388 : vector<1x32xf32> to vector<2x32xf32>
    %390 = arith.mulf %387, %389 : vector<2x32xf32>
    %c278 = arith.constant 278 : index
    %c0_121 = arith.constant 0 : index
    %391 = vector.load %arg3[%c278, %c0_121] : memref<288x128xf32, #tpu.memory_space<vmem>>, vector<1x32xf32>
    %392 = vector.broadcast %391 : vector<1x32xf32> to vector<2x32xf32>
    %393 = arith.addf %390, %392 : vector<2x32xf32>
    %394 = vector.broadcast %385 : vector<2x1xf32> to vector<2x32xf32>
    %395 = arith.mulf %373, %394 : vector<2x32xf32>
    %c277 = arith.constant 277 : index
    %c0_122 = arith.constant 0 : index
    %396 = vector.load %arg3[%c277, %c0_122] : memref<288x128xf32, #tpu.memory_space<vmem>>, vector<1x32xf32>
    %397 = vector.broadcast %396 : vector<1x32xf32> to vector<2x32xf32>
    %398 = arith.mulf %395, %397 : vector<2x32xf32>
    %c279 = arith.constant 279 : index
    %c0_123 = arith.constant 0 : index
    %399 = vector.load %arg3[%c279, %c0_123] : memref<288x128xf32, #tpu.memory_space<vmem>>, vector<1x32xf32>
    %400 = vector.broadcast %399 : vector<1x32xf32> to vector<2x32xf32>
    %401 = arith.addf %398, %400 : vector<2x32xf32>
    %c544 = arith.constant 544 : index
    %c0_124 = arith.constant 0 : index
    %402 = vector.load %arg2[%c544, %c0_124] : memref<640x128xbf16, #tpu.memory_space<vmem>>, vector<32x32xbf16>
    %403 = arith.truncf %393 : vector<2x32xf32> to vector<2x32xbf16>
    %cst_125 = arith.constant dense<0.000000e+00> : vector<2x32xf32>
    %404 = tpu.matmul %403, %402, %cst_125 {dimension_numbers = #tpu.dot_dimension_numbers<[1], [0], [0], [1], [0, 0, 1, 1], [], []>} : vector<2x32xbf16>, vector<32x32xbf16>, vector<2x32xf32> -> vector<2x32xf32>
    %c576 = arith.constant 576 : index
    %c0_126 = arith.constant 0 : index
    %405 = vector.load %arg2[%c576, %c0_126] : memref<640x128xbf16, #tpu.memory_space<vmem>>, vector<32x32xbf16>
    %406 = arith.truncf %401 : vector<2x32xf32> to vector<2x32xbf16>
    %cst_127 = arith.constant dense<0.000000e+00> : vector<2x32xf32>
    %407 = tpu.matmul %406, %405, %cst_127 {dimension_numbers = #tpu.dot_dimension_numbers<[1], [0], [0], [1], [0, 0, 1, 1], [], []>} : vector<2x32xbf16>, vector<32x32xbf16>, vector<2x32xf32> -> vector<2x32xf32>
    %408 = arith.addf %404, %407 : vector<2x32xf32>
    %c280 = arith.constant 280 : index
    %c0_128 = arith.constant 0 : index
    %409 = vector.load %arg3[%c280, %c0_128] : memref<288x128xf32, #tpu.memory_space<vmem>>, vector<1x32xf32>
    %410 = vector.broadcast %409 : vector<1x32xf32> to vector<2x32xf32>
    %411 = arith.addf %408, %410 : vector<2x32xf32>
    %cst_129 = arith.constant 0.000000e+00 : f32
    %412 = vector.broadcast %cst_129 : f32 to vector<2x32xf32>
    %413 = arith.maximumf %411, %412 : vector<2x32xf32>
    %c608 = arith.constant 608 : index
    %c0_130 = arith.constant 0 : index
    %414 = vector.load %arg2[%c608, %c0_130] : memref<640x128xbf16, #tpu.memory_space<vmem>>, vector<32x128xbf16>
    %415 = arith.truncf %413 : vector<2x32xf32> to vector<2x32xbf16>
    %cst_131 = arith.constant dense<0.000000e+00> : vector<2x128xf32>
    %416 = tpu.matmul %415, %414, %cst_131 {dimension_numbers = #tpu.dot_dimension_numbers<[1], [0], [0], [1], [0, 0, 1, 1], [], []>} : vector<2x32xbf16>, vector<32x128xbf16>, vector<2x128xf32> -> vector<2x128xf32>
    %c281 = arith.constant 281 : index
    %c0_132 = arith.constant 0 : index
    %417 = vector.load %arg3[%c281, %c0_132] : memref<288x128xf32, #tpu.memory_space<vmem>>, vector<1x128xf32>
    %418 = vector.broadcast %417 : vector<1x128xf32> to vector<2x128xf32>
    %419 = arith.addf %416, %418 : vector<2x128xf32>
    %c0_133 = arith.constant 0 : index
    %c0_134 = arith.constant 0 : index
    %420 = vector.load %arg4[%c0_133, %c0_134] : memref<2x128xf32, #tpu.memory_space<vmem>>, vector<2x128xf32>
    tpu.vector_store %arg4[%c0_133, %c0_134], %419 {strides = array<i32>} : memref<2x128xf32, #tpu.memory_space<vmem>>, vector<2x128xf32>,
    return
  }
}

</mosaic_0001>

<bundles_post_ra>
// kernel: dynamics_transformer.1
= control target key start
LH: loop header
LB: loop body
LE: loop exit
PB: predicated region body
PF: predicated region fallthrough
CT: control target
= control target key end

     0   :  { %9 = vsyncpa [#allocation3], 0  ;;  %s2963_s0 = inlined_call_operand.hbm [shape: f32[2,16], index: 0, kind: input, shape index: {}]   ;;  %s2964_s1 = inlined_call_operand.hbm [shape: f32[16,12], index: 1, kind: input, shape index: {}]   ;;  %s2965_s2 = inlined_call_operand.hbm [shape: bf16[640,128], index: 2, kind: input, shape index: {}]   ;;  %s2966_s3 = inlined_call_operand.hbm [shape: f32[288,128], index: 3, kind: input, shape index: {}]   ;;  %s2967_s4 = inlined_call_operand.vmem [shape: f32[2,128], index: 4, kind: output, shape index: {}]  }
   0x1   :  { %10 = vsyncpa [#allocation5], 0  ;;  %s27_s17 = sshll.u32 %s2964_s1, 4  ;;  %s28_s17 = int_to_ptr.hbm [resolvable:$true] %s27_s17 }
   0x2   :  { %11 = vsyncpa [#allocation8], 0  ;;  %s2553_s18 = smov [#allocation4]   ;;  %s17_s22 = sshll.u32 %s2963_s0, 4  ;;  %s18_s22 = int_to_ptr.hbm [resolvable:$true] %s17_s22 }
   0x3   :  { %s29_s19 = sshll.u32 %s2553_s18, 4  ;;  %s2554_s23 = smov 128   ;;  %s30_s19 = int_to_ptr.vmem [resolvable:$true] %s29_s19 }
   0x4   :  { %s2555_s24 = smov 8   ;;  %s2556_s25 = smov [#allocation2]  }
   0x5   :  { %35 = dma.hbm_to_vmem [thread:$0]  %s28_s17, 256, %s30_s19, [#allocation5], %s2554_s23, %s2554_s23, %s2555_s24  }
   0x6   :  { %s19_s26 = sshll.u32 %s2556_s25, 4  ;;  %s40_s1 = sshll.u32 %s2965_s2, 4  ;;  %s20_s26 = int_to_ptr.vmem [resolvable:$true] %s19_s26  ;;  %s41_s1 = int_to_ptr.hbm [resolvable:$true] %s40_s1 }
   0x7   :  { %22 = dma.hbm_to_vmem [thread:$0]  %s18_s22, 32, %s20_s26, [#allocation3]  }
   0x8   :  { %s2557_s29 = smov [#allocation6]   ;;  %s53_s0 = sshll.u32 %s2966_s3, 4  ;;  %s54_s0 = int_to_ptr.hbm [resolvable:$true] %s53_s0 }
   0x9   :  { %s42_s30 = sshll.u32 %s2557_s29, 4  ;;  %s2558_s7 = smov 64   ;;  %s43_s30 = int_to_ptr.vmem [resolvable:$true] %s42_s30 }
   0xa   :  { %s2559_s8 = smov 4   ;;  %s2560_s9 = smov [#allocation7]  }
   0xb   :  { %48 = dma.hbm_to_vmem [thread:$0]  %s41_s1, 5120, %s43_s30, [#allocation5], %s2558_s7, %s2558_s7, %s2559_s8  }
   0xc   :  { %s55_s10 = sshll.u32 %s2560_s9, 4  ;;  %s56_s10 = int_to_ptr.vmem [resolvable:$true] %s55_s10 }
   0xd   :  { %61 = dma.hbm_to_vmem [thread:$0]  %s54_s0, 4608, %s56_s10, [#allocation8], %s2554_s23, %s2554_s23, %s2555_s24  }
   0xe   :  { %2547 = dma.done.wait [#allocation3], 32  }
   0xf   :  { %2548 = vsyncadd [#allocation3], 4294967264 }
  0x10   :  { %2549 = dma.done.wait [#allocation5], 5376  }
  0x11   :  { %2550 = vsyncadd [#allocation5], 4294961920 }
  0x12   :  { %2551 = dma.done.wait [#allocation8], 4608  }
  0x13   :  { %2552 = vsyncadd [#allocation8], 4294962688  ;;  %v2054_v0 = vld [vmem:[#allocation6 + $0x18] sm:$0xf]  ;;  %v2246_v1 = vld [vmem:[#allocation6 + $0x18] sm:$0x30] }
  0x14   :  { %vm161_vm0 = vcmask 1045504   ;;  %v145_v2 = vld [vmem:[#allocation4] sm:$0xff]  ;;  %v2055_v3 = vor.u32 %v2246_v1, %v2054_v0  ;;  %v146_v4 = vld [vmem:[#allocation4 + $0x8] sm:$0xff]  ;;  %vm157_vm1 = vcmask 97280   ;;  %v2248_v7 = vld [vmem:[#allocation6 + $0x28] sm:$0xff]  ;;  %vm91_vm2 = vcmask 130048  }
  0x15   :  { %v149_v6 = vpack.c.bf16 %v146_v4, %v145_v2  ;;  %209 = vmatpush.bf16.msra.mxu3 %v2248_v7  ;;  %v2247_v8 = vld [vmem:[#allocation6 + $0x20] sm:$0xff]  ;;  %v79_v10 = vld [vmem:[#allocation2] sm:$0x3]  ;;  %vm128_vm3 = vcmask 261120   ;;  %v2250_v20 = vld [vmem:[#allocation6 + $0x38] sm:$0xff]  ;;  %s2561_s2 = smov 88  }
  0x16   :  { %v163_v5 = vsel %vm161_vm0, %v2055_v3, 0  ;;  %v2243_v9 = vld [vmem:[#allocation6] sm:$0xff]  ;;  %v82_v11 = vpack.c.bf16 %v79_v10, %v79_v10  ;;  %v2249_v21 = vld [vmem:[#allocation6 + $0x30] sm:$0xff]  ;;  %v2244_v26 = vld [vmem:[#allocation6 + $0x8] sm:$0xff]  ;;  %s2562_s3 = smov 96   ;;  %s2563_s11 = smov 120  }
  0x17   :  { %172 = vmatpush.bf16.msra.mxu2 %v163_v5  ;;  %102 = vmatpush.bf16.msra.mxu0 %v2243_v9  ;;  %v2339_v13 = vld [vmem:[#allocation7 + $0x102] ss:$0 sm:$0xff]  ;;  %v2341_v22 = vld [vmem:[#allocation7 + $0x100] ss:$0 sm:$0xff]  ;;  %v2245_v24 = vld [vmem:[#allocation6 + $0x10] sm:$0xff]  ;;  %s2564_s12 = smov 80  }
  0x18   :  { %138 = vmatpush.bf16.msra.mxu1 %v2245_v24  ;;  %v2340_v31 = vld [vmem:[#allocation7 + $0x103] ss:$0 sm:$0xff]  ;;  %v2342_v39 = vld [vmem:[#allocation7 + $0x104] ss:$0 sm:$0xff]  ;;  %s2565_s13 = smov 112   ;;  %s2566_s14 = smov 72  }
  0x19   :  { %210 = vmatpush.bf16.msra.mxu3 %v2247_v8  ;;  %v217_v33 = vld [vmem:[#allocation7] sm:$0xff]  ;;  %s2567_s15 = smov 104   ;;  %vm263_vm4 = vcmask 64512   ;;  %s2568_s16 = smov 56   ;;  %vm338_vm5 = vcmask 1043456   ;;  %vm746_vm6 = vcmask 195584  }
  0x1a   :  { %2056 = vmatmul.msk.bf16.vlgmr.msra.gmra.mxu2 %vm157_vm1, %v149_v6  ;;  %2042 = vmatmul.msk.bf16.vlgmr.msra.gmra.mxu0 %vm91_vm2, %v82_v11  ;;  %s2569_s17 = smov 48   ;;  %s2570_s18 = smov 40  }
  0x1b   :  { %248 = vmatpush.bf16.msrb.mxu0 %v2250_v20  ;;  %s2571_s19 = smov 16   ;;  %s2572_s20 = smov 24  }
  0x1c   :  { %139 = vmatpush.bf16.msra.mxu1 %v2244_v26 }
  0x1f   :  { %249 = vmatpush.bf16.msrb.mxu0 %v2249_v21 }
  0x97   :  { %v104_v23 = vpop.f32.mrf.mxu0 }
  0x98   :  { %v105_v25 = vadd.f32 %v2341_v22, %v104_v23 }
  0x9a   :  { %v108_v27 = vmax.f32 %v105_v25, 0.0 }
  0x9c   :  { %v113_v28 = vpack.c.bf16 %v108_v27, %v108_v27 }
  0x9d   :  { %v174_v12 = vpop.f32.mrf.mxu2 }
  0x9e   :  { %v175_v14 = vadd.f32 %v2339_v13, %v174_v12  ;;  %2051 = vmatmul.msk.bf16.vlgmr.msra.gmra.mxu1 %vm128_vm3, %v113_v28 }
  0x9f   :  { %v106_v29 = vpop.f32.mrf.mxu0 }
  0xa0   :  { %v179_v17 = vmax.f32 %v175_v14, 0.0 }
  0xa5   :  { %v176_v15 = vpop.f32.mrf.mxu2 }
  0xa6   :  { %v177_v16 = vadd.f32 %v2339_v13, %v176_v15 }
  0xa8   :  { %v180_v18 = vmax.f32 %v177_v16, 0.0 }
  0xaa   :  { %v185_v19 = vpack.c.bf16 %v180_v18, %v179_v17 }
  0xac   :  { %2065 = vmatmul.msk.bf16.vlgmr.msra.gmra.mxu3 %vm128_vm3, %v185_v19 }
 0x11b   :  { %v2659_v50 = vpop.f32.mrf.mxu1 }
 0x123   :  { %v143_v51 = vpop.f32.mrf.mxu1 }
 0x12f   :  { %v212_v30 = vpop.f32.mrf.mxu3 }
 0x130   :  { %v213_v32 = vadd.f32 %v2340_v31, %v212_v30 }
 0x132   :  { %v2620_v36 = vadd.f32 %v217_v33, %v213_v32 }
 0x137   :  { %v214_v34 = vpop.f32.mrf.mxu3 }
 0x138   :  { %v215_v35 = vadd.f32 %v2340_v31, %v214_v34 }
 0x13a   :  { %v2622_v37 = vadd.f32 %v217_v33, %v215_v35 }
 0x13c   :  { %v224_v38 = vpack.c.bf16 %v2622_v37, %v2620_v36 }
 0x13e   :  { %2074 = vmatmul.msk.bf16.vlgmr.msrb.gmra.mxu0 %vm128_vm3, %v224_v38 }
 0x1bb   :  { %v251_v40 = vpop.f32.mrf.mxu0 }
 0x1bc   :  { %v252_v41 = vadd.f32 %v2342_v39, %v251_v40 }
 0x1be   :  { %v256_v42 = vpack.c.bf16 %v252_v41, %v252_v41 }
 0x1c0   :  { %v259_v43 = vunpack.c.l.b16 %v256_v42 }
 0x1c2   :  { %v2627_v44 = vpack.c.b16 %v259_v43, %v259_v43 }
 0x1c3   :  { %v253_v45 = vpop.f32.mrf.mxu0 }
 0x1c4   :  { %v254_v46 = vadd.f32 %v2342_v39, %v253_v45  ;;  %378 = vrot.lane.b32.xlu1 %v2627_v44, %s2561_s2  ;;  %261 = vrot.lane.b32.xlu0 %v2627_v44, %s2562_s3 }
 0x1c6   :  { %v257_v47 = vpack.c.bf16 %v254_v46, %v254_v46 }
 0x1c8   :  { %v284_v48 = vunpack.c.l.b16 %v257_v47 }
 0x1ca   :  { %v2633_v49 = vpack.c.b16 %v284_v48, %v284_v48 }
 0x1cc   :  { %401 = vrot.lane.b32.xlu2 %v2633_v49, %s2561_s2  ;;  %376 = vrot.lane.b32.xlu1 %v2627_v44, %s2563_s11 }
 0x1cd   :  { %286 = vrot.lane.b32.xlu0 %v2633_v49, %s2562_s3 }
 0x1d4   :  { %492 = vrot.lane.b32.xlu2 %v2627_v44, %s2564_s12  ;;  %490 = vrot.lane.b32.xlu1 %v2627_v44, %s2565_s13 }
 0x1d5   :  { %399 = vrot.lane.b32.xlu0 %v2633_v49, %s2563_s11 }
 0x1dc   :  { %515 = vrot.lane.b32.xlu2 %v2633_v49, %s2564_s12  ;;  %513 = vrot.lane.b32.xlu1 %v2633_v49, %s2565_s13 }
 0x1dd   :  { %606 = vrot.lane.b32.xlu0 %v2627_v44, %s2566_s14 }
 0x1e4   :  { %604 = vrot.lane.b32.xlu2 %v2627_v44, %s2567_s15  ;;  %627 = vrot.lane.b32.xlu1 %v2633_v49, %s2567_s15 }
 0x1e5   :  { %629 = vrot.lane.b32.xlu0 %v2633_v49, %s2566_s14 }
 0x226   :  { %v402_v52 = vpop.permute.xlu2 %401 }
 0x227   :  { %v407_v61 = vsel %vm263_vm4, %v402_v52, 0 }
 0x22e   :  { %v493_v57 = vpop.permute.xlu2 %492 }
 0x22f   :  { %v498_v59 = vsel %vm263_vm4, %v493_v57, 0 }
 0x236   :  { %v379_v53 = vpop.permute.xlu1 %378  ;;  %v262_v55 = vpop.permute.xlu0 %261 }
 0x237   :  { %v384_v54 = vsel %vm263_vm4, %v379_v53, 0  ;;  %v268_v56 = vsel %vm263_vm4, %v262_v55, 0  ;;  %v516_v62 = vpop.permute.xlu2 %515 }
 0x238   :  { %277 = vmatpush.bf16.xpose.msrb.mxu2 %v268_v56  ;;  %v521_v0 = vsel %vm263_vm4, %v516_v62, 0 }
 0x23e   :  { %v377_v1 = vpop.permute.xlu1 %376 }
 0x23f   :  { %v287_v58 = vpop.permute.xlu0 %286  ;;  %2075 = vmatmul.msk.bf16.vlgmr.msrb.gmra.mxu2 %vm263_vm4, %v256_v42  ;;  %v605_v8 = vpop.permute.xlu2 %604 }
 0x240   :  { %393 = vmatpush.bf16.xpose.msra.mxu2 %v384_v54  ;;  %v292_v60 = vsel %vm263_vm4, %v287_v58, 0 }
 0x241   :  { %301 = vmatpush.bf16.xpose.msrb.mxu1 %v292_v60 }
 0x246   :  { %v491_v6 = vpop.permute.xlu1 %490 }
 0x247   :  { %v400_v63 = vpop.permute.xlu0 %399 }
 0x248   :  { %507 = vmatpush.bf16.xpose.msrb.mxu2 %v498_v59  ;;  %2076 = vmatmul.msk.bf16.vlgmr.msrb.gmra.mxu1 %vm263_vm4, %v257_v47 }
 0x249   :  { %416 = vmatpush.bf16.xpose.msra.mxu1 %v407_v61 }
 0x24e   :  { %v514_v7 = vpop.permute.xlu1 %513 }
 0x24f   :  { %v607_v2 = vpop.permute.xlu0 %606  ;;  %2079 = vmatmul.msk.bf16.vlgmr.msra.gmra.mxu2 %vm263_vm4, %v377_v1 }
 0x250   :  { %v612_v3 = vsel %vm263_vm4, %v607_v2, 0 }
 0x251   :  { %530 = vmatpush.bf16.xpose.msrb.mxu1 %v521_v0  ;;  %621 = vmatpush.bf16.xpose.msra.mxu2 %v612_v3 }
 0x256   :  { %v628_v9 = vpop.permute.xlu1 %627 }
 0x257   :  { %v630_v4 = vpop.permute.xlu0 %629 }
 0x258   :  { %v635_v5 = vsel %vm263_vm4, %v630_v4, 0  ;;  %2080 = vmatmul.msk.bf16.vlgmr.msra.gmra.mxu1 %vm263_vm4, %v400_v63 }
 0x259   :  { %644 = vmatpush.bf16.xpose.msra.mxu1 %v635_v5 }
 0x25f   :  { %2083 = vmatmul.msk.bf16.vlgmr.msrb.gmra.mxu2 %vm263_vm4, %v491_v6 }
 0x268   :  { %2084 = vmatmul.msk.bf16.vlgmr.msrb.gmra.mxu1 %vm263_vm4, %v514_v7 }
 0x26f   :  { %2087 = vmatmul.msk.bf16.vlgmr.msra.gmra.mxu2 %vm263_vm4, %v605_v8 }
 0x278   :  { %2088 = vmatmul.msk.bf16.vlgmr.msra.gmra.mxu1 %vm263_vm4, %v628_v9 }
 0x2c2   :  { %v279_v10 = vpop.f32.mrf.mxu2 }
 0x2c3   :  { %v307_v11 = vmul.f32 0.35355338, %v279_v10 }
 0x2c5   :  { %v303_v12 = vpop.f32.mrf.mxu1  ;;  %v309_v14 = vsel %vm263_vm4, %v307_v11, -inf }
 0x2c6   :  { %v308_v13 = vmul.f32 0.35355338, %v303_v12  ;;  %310 = vmax.xlane.f32.xlu2 %v309_v14 }
 0x2c8   :  { %v312_v15 = vsel %vm263_vm4, %v308_v13, -inf }
 0x2c9   :  { %313 = vmax.xlane.f32.xlu0 %v312_v15 }
 0x2ca   :  { %v281_v16 = vpop.f32.mrf.mxu2 }
 0x2cd   :  { %v305_v17 = vpop.f32.mrf.mxu1 }
 0x2d2   :  { %v395_v18 = vpop.f32.mrf.mxu2 }
 0x2d3   :  { %v422_v19 = vmul.f32 0.35355338, %v395_v18 }
 0x2d5   :  { %v418_v20 = vpop.f32.mrf.mxu1  ;;  %v424_v22 = vsel %vm263_vm4, %v422_v19, -inf }
 0x2d6   :  { %v423_v21 = vmul.f32 0.35355338, %v418_v20  ;;  %425 = vmax.xlane.f32.xlu1 %v424_v22 }
 0x2d8   :  { %v427_v23 = vsel %vm263_vm4, %v423_v21, -inf }
 0x2d9   :  { %428 = vmax.xlane.f32.xlu2 %v427_v23 }
 0x2da   :  { %v397_v24 = vpop.f32.mrf.mxu2 }
 0x2dd   :  { %v420_v25 = vpop.f32.mrf.mxu1 }
 0x2e2   :  { %v509_v26 = vpop.f32.mrf.mxu2 }
 0x2e3   :  { %v2681_v27 = vmul.f32 0.35355338, %v509_v26 }
 0x2e5   :  { %v532_v28 = vpop.f32.mrf.mxu1  ;;  %v538_v30 = vsel %vm263_vm4, %v2681_v27, -inf }
 0x2e6   :  { %v537_v29 = vmul.f32 0.35355338, %v532_v28  ;;  %539 = vmax.xlane.f32.xlu2 %v538_v30 }
 0x2e8   :  { %v541_v31 = vsel %vm263_vm4, %v537_v29, -inf }
 0x2e9   :  { %542 = vmax.xlane.f32.xlu0 %v541_v31 }
 0x2ea   :  { %v511_v32 = vpop.f32.mrf.mxu2 }
 0x2ed   :  { %v534_v33 = vpop.f32.mrf.mxu1 }
 0x2f2   :  { %v623_v34 = vpop.f32.mrf.mxu2 }
 0x2f3   :  { %v2686_v35 = vmul.f32 0.35355338, %v623_v34 }
 0x2f5   :  { %v646_v38 = vpop.f32.mrf.mxu1  ;;  %v652_v40 = vsel %vm263_vm4, %v2686_v35, -inf }
 0x2f6   :  { %v651_v39 = vmul.f32 0.35355338, %v646_v38  ;;  %653 = vmax.xlane.f32.xlu1 %v652_v40 }
 0x2f8   :  { %v655_v41 = vsel %vm263_vm4, %v651_v39, -inf }
 0x2f9   :  { %656 = vmax.xlane.f32.xlu0 %v655_v41 }
 0x2fa   :  { %v625_v42 = vpop.f32.mrf.mxu2 }
 0x2fd   :  { %v648_v43 = vpop.f32.mrf.mxu1 }
 0x30d   :  { %355 = vrot.lane.b32.xlu0 %v2633_v49, %s2558_s7 }
 0x30f   :  { %448 = vrot.lane.b32.xlu1 %v2627_v44, %s2568_s16 }
 0x315   :  { %469 = vrot.lane.b32.xlu0 %v2633_v49, %s2568_s16 }
 0x317   :  { %562 = vrot.lane.b32.xlu1 %v2627_v44, %s2569_s17 }
 0x339   :  { %v311_v45 = vpop.xlane.xlu2 %310 }
 0x33a   :  { %v315_v46 = vsub.f32 %v307_v11, %v311_v45 }
 0x33c   :  { %v314_v47 = vpop.xlane.xlu0 %313  ;;  %v317_v48 = vmul.f32 1.442695, %v315_v46 }
 0x33d   :  { %v316_v51 = vsub.f32 %v308_v13, %v314_v47 }
 0x33e   :  { %2365 = vpow2.f32 %v317_v48 }
 0x33f   :  { %v319_v52 = vmul.f32 1.442695, %v316_v51 }
 0x341   :  { %2367 = vpow2.f32 %v319_v52 }
 0x344   :  { %v2699_v53 = vpop.eup %2365 }
 0x345   :  { %v321_v54 = vsel %vm263_vm4, %v2699_v53, 0.0 }
 0x346   :  { %322 = vadd.xlane.f32.xlu2 %v321_v54 }
 0x347   :  { %v2703_v55 = vpop.eup %2367 }
 0x348   :  { %v324_v56 = vsel %vm263_vm4, %v2703_v55, 0.0 }
 0x349   :  { %325 = vadd.xlane.f32.xlu1 %v324_v56  ;;  %v426_v57 = vpop.xlane.xlu1 %425 }
 0x34a   :  { %v430_v58 = vsub.f32 %v422_v19, %v426_v57 }
 0x34c   :  { %v429_v59 = vpop.xlane.xlu2 %428  ;;  %v432_v60 = vmul.f32 1.442695, %v430_v58 }
 0x34d   :  { %v431_v61 = vsub.f32 %v423_v21, %v429_v59 }
 0x34e   :  { %2369 = vpow2.f32 %v432_v60 }
 0x34f   :  { %v434_v62 = vmul.f32 1.442695, %v431_v61 }
 0x351   :  { %2371 = vpow2.f32 %v434_v62 }
 0x354   :  { %v2707_v63 = vpop.eup %2369 }
 0x355   :  { %v436_v0 = vsel %vm263_vm4, %v2707_v63, 0.0 }
 0x356   :  { %437 = vadd.xlane.f32.xlu1 %v436_v0 }
 0x357   :  { %v2711_v1 = vpop.eup %2371 }
 0x358   :  { %v439_v4 = vsel %vm263_vm4, %v2711_v1, 0.0 }
 0x359   :  { %v540_v8 = vpop.xlane.xlu2 %539 }
 0x35a   :  { %v544_v9 = vsub.f32 %v2681_v27, %v540_v8 }
 0x35c   :  { %v543_v2 = vpop.xlane.xlu0 %542  ;;  %v546_v11 = vmul.f32 1.442695, %v544_v9 }
 0x35d   :  { %v545_v3 = vsub.f32 %v537_v29, %v543_v2 }
 0x35e   :  { %333 = vrot.lane.b32.xlu2 %v2627_v44, %s2558_s7  ;;  %440 = vadd.xlane.f32.xlu1 %v439_v4 }
 0x35f   :  { %v548_v5 = vmul.f32 1.442695, %v545_v3 }
 0x361   :  { %2373 = vpow2.f32 %v548_v5 }
 0x362   :  { %2375 = vpow2.f32 %v546_v11 }
 0x367   :  { %v2717_v6 = vpop.eup %2373 }
 0x368   :  { %v553_v7 = vsel %vm263_vm4, %v2717_v6, 0.0  ;;  %v2727_v16 = vpop.eup %2375 }
 0x369   :  { %554 = vadd.xlane.f32.xlu0 %v553_v7  ;;  %v550_v18 = vsel %vm263_vm4, %v2727_v16, 0.0  ;;  %v654_v20 = vpop.xlane.xlu1 %653 }
 0x36a   :  { %v658_v22 = vsub.f32 %v2686_v35, %v654_v20 }
 0x36c   :  { %v657_v10 = vpop.xlane.xlu0 %656  ;;  %v660_v23 = vmul.f32 1.442695, %v658_v22 }
 0x36d   :  { %v659_v12 = vsub.f32 %v651_v39, %v657_v10 }
 0x36f   :  { %v662_v15 = vmul.f32 1.442695, %v659_v12 }
 0x371   :  { %2377 = vpow2.f32 %v662_v15 }
 0x372   :  { %2379 = vpow2.f32 %v660_v23 }
 0x377   :  { %583 = vrot.lane.b32.xlu1 %v2633_v49, %s2569_s17 }
 0x37d   :  { %676 = vrot.lane.b32.xlu0 %v2627_v44, %s2570_s18  ;;  %v2732_v44 = vpop.eup %2377 }
 0x37e   :  { %v667_v21 = vsel %vm263_vm4, %v2732_v44, 0.0  ;;  %v2737_v24 = vpop.eup %2379 }
 0x37f   :  { %v356_v13 = vpop.permute.xlu0 %355  ;;  %v664_v25 = vsel %vm263_vm4, %v2737_v24, 0.0 }
 0x380   :  { %v361_v14 = vsel %vm338_vm5, %v356_v13, 0 }
 0x381   :  { %370 = vmatpush.bf16.msra.mxu0 %v361_v14  ;;  %v449_v26 = vpop.permute.xlu1 %448 }
 0x382   :  { %v454_v35 = vsel %vm338_vm5, %v449_v26, 0 }
 0x387   :  { %v470_v17 = vpop.permute.xlu0 %469  ;;  %551 = vadd.xlane.f32.xlu2 %v550_v18 }
 0x388   :  { %v475_v19 = vsel %vm338_vm5, %v470_v17, 0 }
 0x389   :  { %484 = vmatpush.bf16.msrb.mxu0 %v475_v19  ;;  %v563_v27 = vpop.permute.xlu1 %562 }
 0x38a   :  { %v568_v40 = vsel %vm338_vm5, %v563_v27, 0 }
 0x38f   :  { %668 = vadd.xlane.f32.xlu2 %v667_v21 }
 0x3a1   :  { %665 = vadd.xlane.f32.xlu1 %v664_v25 }
 0x3a7   :  { %697 = vrot.lane.b32.xlu2 %v2633_v49, %s2570_s18 }
 0x3b9   :  { %v323_v28 = vpop.xlane.xlu2 %322 }
 0x3ba   :  { %2381 = vrcp.f32 %v323_v28  ;;  %v2252_v28 = vld [vmem:[#allocation6 + $0x48] sm:$0xff] }
 0x3bb   :  { %777 = vmatpush.bf16.msrb.mxu2 %v2252_v28 }
 0x3bc   :  { %v326_v29 = vpop.xlane.xlu1 %325 }
 0x3bd   :  { %2383 = vrcp.f32 %v326_v29  ;;  %v2251_v29 = vld [vmem:[#allocation6 + $0x40] sm:$0xff] }
 0x3bf   :  { %778 = vmatpush.bf16.msrb.mxu2 %v2251_v29 }
 0x3c0   :  { %v2382_v30 = vpop.eup %2381 }
 0x3c1   :  { %v329_v31 = vmul.f32 %v2382_v30, %v2699_v53  ;;  %v334_v32 = vpop.permute.xlu2 %333 }
 0x3c2   :  { %v340_v34 = vsel %vm338_vm5, %v334_v32, 0 }
 0x3c3   :  { %v2384_v33 = vpop.eup %2383  ;;  %349 = vmatpush.bf16.msrb.mxu3 %v340_v34  ;;  %v331_v39 = vpack.c.bf16 %v329_v31, %v329_v31 }
 0x3c4   :  { %v330_v38 = vmul.f32 %v2384_v33, %v2703_v55 }
 0x3c6   :  { %v332_v49 = vpack.c.bf16 %v330_v38, %v330_v38  ;;  %2077 = vmatmul.msk.bf16.vlgmr.msrb.gmra.mxu3 %vm263_vm4, %v331_v39 }
 0x3c7   :  { %463 = vmatpush.bf16.msra.mxu3 %v454_v35 }
 0x3c8   :  { %2078 = vmatmul.msk.bf16.vlgmr.msra.gmra.mxu0 %vm263_vm4, %v332_v49 }
 0x3c9   :  { %v438_v41 = vpop.xlane.xlu1 %437 }
 0x3ca   :  { %2385 = vrcp.f32 %v438_v41 }
 0x3cb   :  { %577 = vmatpush.bf16.msrb.mxu3 %v568_v40 }
 0x3d0   :  { %v2386_v42 = vpop.eup %2385 }
 0x3d1   :  { %v444_v43 = vmul.f32 %v2386_v42, %v2707_v63  ;;  %v441_v45 = vpop.xlane.xlu1 %440 }
 0x3d2   :  { %2387 = vrcp.f32 %v441_v45 }
 0x3d3   :  { %v446_v46 = vpack.c.bf16 %v444_v43, %v444_v43 }
 0x3d6   :  { %2081 = vmatmul.msk.bf16.vlgmr.msra.gmra.mxu3 %vm263_vm4, %v446_v46 }
 0x3d8   :  { %v2388_v47 = vpop.eup %2387 }
 0x3d9   :  { %v445_v48 = vmul.f32 %v2388_v47, %v2711_v1 }
 0x3db   :  { %v447_v51 = vpack.c.bf16 %v445_v48, %v445_v48  ;;  %v2344_v48 = vld [vmem:[#allocation7 + $0x105] ss:$0 sm:$0xff] }
 0x3dc   :  { %v555_v52 = vpop.xlane.xlu0 %554 }
 0x3dd   :  { %2082 = vmatmul.msk.bf16.vlgmr.msrb.gmra.mxu0 %vm263_vm4, %v447_v51  ;;  %2389 = vrcp.f32 %v555_v52 }
 0x3e3   :  { %v2390_v53 = vpop.eup %2389 }
 0x3e4   :  { %v559_v54 = vmul.f32 %v2390_v53, %v2717_v6 }
 0x3e6   :  { %v561_v57 = vpack.c.bf16 %v559_v54, %v559_v54 }
 0x3e9   :  { %v584_v55 = vpop.permute.xlu1 %583 }
 0x3ea   :  { %v589_v56 = vsel %vm338_vm5, %v584_v55, 0 }
 0x3eb   :  { %598 = vmatpush.bf16.msra.mxu0 %v589_v56 }
 0x3ee   :  { %2086 = vmatmul.msk.bf16.vlgmr.msra.gmra.mxu0 %vm263_vm4, %v561_v57 }
 0x3ef   :  { %v677_v58 = vpop.permute.xlu0 %676 }
 0x3f0   :  { %v682_v59 = vsel %vm338_vm5, %v677_v58, 0 }
 0x3f1   :  { %691 = vmatpush.bf16.msra.mxu3 %v682_v59  ;;  %v2573_v59 = vmov 32.0  }
 0x3fa   :  { %v552_v60 = vpop.xlane.xlu2 %551 }
 0x3fb   :  { %2391 = vrcp.f32 %v552_v60 }
 0x401   :  { %v2392_v61 = vpop.eup %2391 }
 0x402   :  { %v558_v62 = vmul.f32 %v2392_v61, %v2727_v16  ;;  %v669_v63 = vpop.xlane.xlu2 %668 }
 0x403   :  { %2393 = vrcp.f32 %v669_v63 }
 0x404   :  { %v560_v0 = vpack.c.bf16 %v558_v62, %v558_v62 }
 0x406   :  { %2085 = vmatmul.msk.bf16.vlgmr.msrb.gmra.mxu3 %vm263_vm4, %v560_v0 }
 0x409   :  { %v2394_v1 = vpop.eup %2393 }
 0x40a   :  { %v673_v2 = vmul.f32 %v2394_v1, %v2732_v44  ;;  %v698_v3 = vpop.permute.xlu2 %697 }
 0x40b   :  { %v703_v4 = vsel %vm338_vm5, %v698_v3, 0 }
 0x40c   :  { %v675_v5 = vpack.c.bf16 %v673_v2, %v673_v2  ;;  %712 = vmatpush.bf16.msrb.mxu0 %v703_v4 }
 0x40f   :  { %2090 = vmatmul.msk.bf16.vlgmr.msrb.gmra.mxu0 %vm263_vm4, %v675_v5 }
 0x414   :  { %v666_v6 = vpop.xlane.xlu1 %665 }
 0x415   :  { %2395 = vrcp.f32 %v666_v6 }
 0x416   :  { %2397 = vrcp.f32 %v2573_v59 }
 0x41b   :  { %v2396_v7 = vpop.eup %2395 }
 0x41c   :  { %v672_v8 = vmul.f32 %v2396_v7, %v2737_v24  ;;  %v2398_v60 = vpop.eup %2397 }
 0x41d   :  { %v794_v61 = vmul.f32 32.0, %v2398_v60  ;;  %vm798_vm7 = vweird.f32 %v2398_v60 }
 0x41e   :  { %v674_v9 = vpack.c.bf16 %v672_v8, %v672_v8 }
 0x41f   :  { %v795_v62 = vsub.f32 1.0, %v794_v61 }
 0x420   :  { %2089 = vmatmul.msk.bf16.vlgmr.msra.gmra.mxu3 %vm263_vm4, %v674_v9 }
 0x421   :  { %v796_v63 = vmul.f32 %v2398_v60, %v795_v62 }
 0x423   :  { %v797_v0 = vadd.f32 %v2398_v60, %v796_v63 }
 0x425   :  { %v2779_v1 = vsel %vm798_vm7, %v2398_v60, %v797_v0  ;;  %v2348_v60 = vld [vmem:[#allocation7 + $0x109] ss:$0 sm:$0xff] }
 0x445   :  { %v372_v10 = vpop.f32.mrf.mxu0 }
 0x449   :  { %v351_v11 = vpop.f32.mrf.mxu3 }
 0x44d   :  { %v374_v12 = vpop.f32.mrf.mxu0 }
 0x451   :  { %v353_v13 = vpop.f32.mrf.mxu3 }
 0x452   :  { %v2253_v13 = vld [vmem:[#allocation6 + $0x50] sm:$0xff] }
 0x459   :  { %v465_v14 = vpop.f32.mrf.mxu3 }
 0x45a   :  { %v486_v15 = vpop.f32.mrf.mxu0 }
 0x45b   :  { %v2306_v16 = vpack.i.bf16 %v486_v15, %v465_v14  ;;  %v2262_v15 = vld [vmem:[#allocation6 + $0x98] sm:$0xff] }
 0x45c   :  { %951 = vmatpush.bf16.msrb.mxu3 %v2262_v15 }
 0x45d   :  { %2307 = vrot.lane.b32.xlu0 %v2306_v16, %s2555_s24 }
 0x461   :  { %v467_v17 = vpop.f32.mrf.mxu3 }
 0x462   :  { %v488_v18 = vpop.f32.mrf.mxu0 }
 0x463   :  { %v2261_v18 = vld [vmem:[#allocation6 + $0x90] sm:$0xff] }
 0x464   :  { %952 = vmatpush.bf16.msrb.mxu3 %v2261_v18 }
 0x46b   :  { %v600_v19 = vpop.f32.mrf.mxu0 }
 0x473   :  { %v602_v44 = vpop.f32.mrf.mxu0 }
 0x489   :  { %v579_v20 = vpop.f32.mrf.mxu3 }
 0x48a   :  { %v2311_v21 = vpack.i.bf16 %v600_v19, %v579_v20 }
 0x48c   :  { %2312 = vrot.lane.b32.xlu2 %v2311_v21, %s2571_s19  ;;  %v714_v22 = vpop.f32.mrf.mxu0  ;;  %v2260_v21 = vld [vmem:[#allocation6 + $0x88] sm:$0xff] }
 0x48d   :  { %953 = vmatpush.bf16.msrb.mxu3 %v2260_v21 }
 0x491   :  { %v581_v23 = vpop.f32.mrf.mxu3 }
 0x494   :  { %v716_v24 = vpop.f32.mrf.mxu0 }
 0x495   :  { %v2259_v24 = vld [vmem:[#allocation6 + $0x80] sm:$0xff] }
 0x496   :  { %954 = vmatpush.bf16.msrb.mxu3 %v2259_v24 }
 0x4a3   :  { %v693_v25 = vpop.f32.mrf.mxu3 }
 0x4a4   :  { %v2316_v26 = vpack.i.bf16 %v714_v22, %v693_v25 }
 0x4a6   :  { %2317 = vrot.lane.b32.xlu0 %v2316_v26, %s2572_s20 }
 0x4ab   :  { %v695_v27 = vpop.f32.mrf.mxu3 }
 0x4cf   :  { %v2308_v30 = vpop.permute.xlu0 %2307 }
 0x4d0   :  { %v2310_v32 = vunpack.i.h.bf16 %v2308_v30  ;;  %v2309_v33 = vunpack.i.l.bf16 %v2308_v30 }
 0x4d2   :  { %v743_v39 = vsel %vm263_vm4, %v372_v10, %v2310_v32  ;;  %v742_v49 = vsel %vm263_vm4, %v351_v11, %v2309_v33  ;;  %v2254_v10 = vld [vmem:[#allocation6 + $0x58] sm:$0xff]  ;;  %v2345_v33 = vld [vmem:[#allocation7 + $0x106] ss:$0 sm:$0xff] }
 0x4d3   :  { %874 = vmatpush.bf16.msrb.mxu1 %v2254_v10 }
 0x4d7   :  { %875 = vmatpush.bf16.msrb.mxu1 %v2253_v13 }
 0x4e6   :  { %v2313_v31 = vpop.permute.xlu2 %2312 }
 0x4e7   :  { %v2315_v34 = vunpack.i.h.bf16 %v2313_v31  ;;  %v2314_v35 = vunpack.i.l.bf16 %v2313_v31 }
 0x4e9   :  { %v744_v42 = vsel %vm91_vm2, %v742_v49, %v2314_v35  ;;  %v745_v43 = vsel %vm91_vm2, %v743_v39, %v2315_v34  ;;  %v2346_v39 = vld [vmem:[#allocation7 + $0x107] ss:$0 sm:$0xff] }
 0x518   :  { %v2318_v38 = vpop.permute.xlu0 %2317 }
 0x519   :  { %v2320_v40 = vunpack.i.h.bf16 %v2318_v38  ;;  %v2319_v41 = vunpack.i.l.bf16 %v2318_v38 }
 0x51b   :  { %v747_v45 = vsel %vm746_vm6, %v744_v42, %v2319_v41  ;;  %v748_v46 = vsel %vm746_vm6, %v745_v43, %v2320_v40 }
 0x51c   :  { %v753_v47 = vpack.c.bf16 %v748_v46, %v747_v45  ;;  %v2258_v46 = vld [vmem:[#allocation6 + $0x78] sm:$0xff] }
 0x51d   :  { %955 = vmatpush.bf16.msrb.mxu3 %v2258_v46  ;;  %v2351_v46 = vld [vmem:[#allocation7 + $0x10c] ss:$0 sm:$0xff] }
 0x51e   :  { %2099 = vmatmul.msk.bf16.vlgmr.msrb.gmra.mxu2 %vm128_vm3, %v753_v47  ;;  %v2257_v47 = vld [vmem:[#allocation6 + $0x70] sm:$0xff] }
 0x521   :  { %956 = vmatpush.bf16.msrb.mxu3 %v2257_v47 }
 0x5a1   :  { %v780_v51 = vpop.f32.mrf.mxu2 }
 0x5a2   :  { %v781_v52 = vadd.f32 %v2344_v48, %v780_v51  ;;  %v2255_v51 = vld [vmem:[#allocation6 + $0x60] sm:$0xff] }
 0x5a4   :  { %v785_v53 = vadd.f32 %v781_v52, %v2620_v36 }
 0x5a6   :  { %v787_v54 = vsel %vm128_vm3, %v785_v53, 0.0 }
 0x5a7   :  { %788 = vadd.xlane.f32.xlu1 %v787_v54 }
 0x5a9   :  { %v782_v55 = vpop.f32.mrf.mxu2 }
 0x5aa   :  { %v783_v56 = vadd.f32 %v2344_v48, %v782_v55  ;;  %v2256_v48 = vld [vmem:[#allocation6 + $0x68] sm:$0xff] }
 0x5ab   :  { %957 = vmatpush.bf16.msrb.mxu3 %v2256_v48 }
 0x5ac   :  { %v786_v57 = vadd.f32 %v783_v56, %v2622_v37 }
 0x5ae   :  { %v790_v58 = vsel %vm128_vm3, %v786_v57, 0.0 }
 0x5af   :  { %791 = vadd.xlane.f32.xlu2 %v790_v58  ;;  %958 = vmatpush.bf16.msrb.mxu3 %v2255_v51 }
 0x61a   :  { %v789_v36 = vpop.xlane.xlu1 %788 }
 0x61b   :  { %v800_v2 = vmul.f32 %v2779_v1, %v789_v36 }
 0x61d   :  { %v802_v3 = vsub.f32 %v785_v53, %v800_v2  ;;  %v2347_v53 = vld [vmem:[#allocation7 + $0x108] ss:$0 sm:$0xff] }
 0x61f   :  { %v804_v4 = vmul.f32 %v802_v3, %v802_v3 }
 0x621   :  { %v806_v37 = vsel %vm128_vm3, %v804_v4, 0.0 }
 0x622   :  { %v792_v5 = vpop.xlane.xlu2 %791  ;;  %807 = vadd.xlane.f32.xlu0 %v806_v37 }
 0x623   :  { %v801_v6 = vmul.f32 %v2779_v1, %v792_v5 }
 0x625   :  { %v803_v7 = vsub.f32 %v786_v57, %v801_v6 }
 0x627   :  { %v805_v8 = vmul.f32 %v803_v7, %v803_v7 }
 0x629   :  { %v809_v9 = vsel %vm128_vm3, %v805_v8, 0.0 }
 0x62a   :  { %810 = vadd.xlane.f32.xlu1 %v809_v9 }
 0x695   :  { %v808_v11 = vpop.xlane.xlu0 %807 }
 0x696   :  { %v812_v12 = vmul.f32 %v808_v11, %v2779_v1 }
 0x698   :  { %v814_v14 = vadd.f32 1e-05, %v812_v12 }
 0x69a   :  { %2399 = vrsqrt.f32 %v814_v14  ;;  %vm822_vm9 = vweird.f32 %v814_v14 }
 0x69d   :  { %v811_v16 = vpop.xlane.xlu1 %810 }
 0x69e   :  { %v813_v17 = vmul.f32 %v811_v16, %v2779_v1 }
 0x6a0   :  { %v2400_v19 = vpop.eup %2399  ;;  %v815_v44 = vadd.f32 1e-05, %v813_v17  ;;  %v2263_v17 = vld [vmem:[#allocation6 + $0xa0] sm:$0xff] }
 0x6a1   :  { %v817_v20 = vmul.f32 %v2400_v19, %v814_v14  ;;  %vm823_vm8 = vweird.f32 %v2400_v19  ;;  %v2264_v14 = vld [vmem:[#allocation6 + $0xa8] sm:$0xff] }
 0x6a2   :  { %2401 = vrsqrt.f32 %v815_v44  ;;  %vm824_vm10 = vmor %vm822_vm9, %vm823_vm8  ;;  %vm832_vm12 = vweird.f32 %v815_v44  ;;  %1047 = vmatpush.bf16.msra.mxu0 %v2264_v14 }
 0x6a3   :  { %v818_v22 = vmul.f32 %v2400_v19, %v817_v20 }
 0x6a5   :  { %v819_v23 = vmul.f32 0.5, %v818_v22 }
 0x6a6   :  { %1048 = vmatpush.bf16.msra.mxu0 %v2263_v17 }
 0x6a7   :  { %v820_v25 = vsub.f32 1.5, %v819_v23 }
 0x6a8   :  { %v2402_v26 = vpop.eup %2401 }
 0x6a9   :  { %v821_v27 = vmul.f32 %v2400_v19, %v820_v25  ;;  %v827_v28 = vmul.f32 %v2402_v26, %v815_v44  ;;  %vm833_vm11 = vweird.f32 %v2402_v26 }
 0x6aa   :  { %vm834_vm13 = vmor %vm832_vm12, %vm833_vm11  ;;  %vm1808_vm11 = vcmask 254976  }
 0x6ab   :  { %v828_v29 = vmul.f32 %v2402_v26, %v827_v28  ;;  %v825_v30 = vsel %vm824_vm10, %v2400_v19, %v821_v27 }
 0x6ac   :  { %v836_v34 = vmul.f32 %v825_v30, %v802_v3 }
 0x6ad   :  { %v829_v31 = vmul.f32 0.5, %v828_v29 }
 0x6ae   :  { %v840_v49 = vmul.f32 %v2345_v33, %v836_v34 }
 0x6af   :  { %v830_v32 = vsub.f32 1.5, %v829_v31 }
 0x6b0   :  { %v844_v42 = vadd.f32 %v2346_v39, %v840_v49 }
 0x6b1   :  { %v831_v35 = vmul.f32 %v2402_v26, %v830_v32 }
 0x6b3   :  { %v835_v38 = vsel %vm834_vm13, %v2402_v26, %v831_v35 }
 0x6b4   :  { %v837_v40 = vmul.f32 %v835_v38, %v803_v7 }
 0x6b6   :  { %v841_v41 = vmul.f32 %v2345_v33, %v837_v40  ;;  %v2349_v33 = vld [vmem:[#allocation7 + $0x10a] ss:$0 sm:$0xff] }
 0x6b8   :  { %v845_v43 = vadd.f32 %v2346_v39, %v841_v41  ;;  %v2350_v39 = vld [vmem:[#allocation7 + $0x10b] ss:$0 sm:$0xff] }
 0x6ba   :  { %v850_v45 = vpack.c.bf16 %v845_v43, %v844_v42 }
 0x6bc   :  { %2108 = vmatmul.msk.bf16.vlgmr.msrb.gmra.mxu1 %vm128_vm3, %v850_v45 }
 0x739   :  { %v877_v52 = vpop.f32.mrf.mxu1 }
 0x73a   :  { %v878_v54 = vadd.f32 %v2347_v53, %v877_v52 }
 0x73c   :  { %v882_v57 = vmax.f32 %v878_v54, 0.0 }
 0x741   :  { %v879_v55 = vpop.f32.mrf.mxu1 }
 0x742   :  { %v880_v56 = vadd.f32 %v2347_v53, %v879_v55 }
 0x744   :  { %v883_v58 = vmax.f32 %v880_v56, 0.0 }
 0x746   :  { %v900_v59 = vpack.c.bf16 %v883_v58, %v882_v57 }
 0x748   :  { %959 = vmatmul.bf16.vlgmr.msrb.gmra.mxu3 %v900_v59 }
 0x7cb   :  { %v960_v61 = vpop.f32.mrf.mxu3 }
 0x7cc   :  { %v961_v62 = vadd.f32 %v2348_v60, %v960_v61 }
 0x7ce   :  { %v965_v63 = vadd.f32 %v961_v62, %v844_v42 }
 0x7d0   :  { %v967_v0 = vsel %vm128_vm3, %v965_v63, 0.0 }
 0x7d1   :  { %968 = vadd.xlane.f32.xlu1 %v967_v0 }
 0x7d3   :  { %v962_v36 = vpop.f32.mrf.mxu3 }
 0x7d4   :  { %v963_v2 = vadd.f32 %v2348_v60, %v962_v36 }
 0x7d6   :  { %v966_v3 = vadd.f32 %v963_v2, %v845_v43 }
 0x7d8   :  { %v970_v4 = vsel %vm128_vm3, %v966_v3, 0.0 }
 0x7d9   :  { %971 = vadd.xlane.f32.xlu1 %v970_v4 }
 0x844   :  { %v969_v37 = vpop.xlane.xlu1 %968 }
 0x845   :  { %v973_v5 = vmul.f32 %v969_v37, %v2779_v1 }
 0x847   :  { %v975_v6 = vsub.f32 %v965_v63, %v973_v5 }
 0x849   :  { %v977_v7 = vmul.f32 %v975_v6, %v975_v6 }
 0x84b   :  { %v979_v8 = vsel %vm128_vm3, %v977_v7, 0.0 }
 0x84c   :  { %980 = vadd.xlane.f32.xlu1 %v979_v8  ;;  %v972_v9 = vpop.xlane.xlu1 %971 }
 0x84d   :  { %v974_v10 = vmul.f32 %v972_v9, %v2779_v1 }
 0x84f   :  { %v976_v11 = vsub.f32 %v966_v3, %v974_v10 }
 0x851   :  { %v978_v12 = vmul.f32 %v976_v11, %v976_v11 }
 0x853   :  { %v982_v13 = vsel %vm128_vm3, %v978_v12, 0.0 }
 0x854   :  { %983 = vadd.xlane.f32.xlu1 %v982_v13 }
 0x8bf   :  { %v981_v15 = vpop.xlane.xlu1 %980 }
 0x8c0   :  { %v985_v16 = vmul.f32 %v981_v15, %v2779_v1 }
 0x8c2   :  { %v987_v18 = vadd.f32 1e-05, %v985_v16 }
 0x8c4   :  { %2403 = vrsqrt.f32 %v987_v18  ;;  %vm995_vm15 = vweird.f32 %v987_v18 }
 0x8c7   :  { %v984_v19 = vpop.xlane.xlu1 %983 }
 0x8c8   :  { %v986_v44 = vmul.f32 %v984_v19, %v2779_v1 }
 0x8ca   :  { %v2404_v20 = vpop.eup %2403  ;;  %v988_v21 = vadd.f32 1e-05, %v986_v44 }
 0x8cb   :  { %v990_v22 = vmul.f32 %v2404_v20, %v987_v18  ;;  %vm996_vm14 = vweird.f32 %v2404_v20 }
 0x8cc   :  { %2405 = vrsqrt.f32 %v988_v21  ;;  %vm997_vm0 = vmor %vm995_vm15, %vm996_vm14  ;;  %vm1005_vm7 = vweird.f32 %v988_v21 }
 0x8cd   :  { %v991_v23 = vmul.f32 %v2404_v20, %v990_v22 }
 0x8cf   :  { %v992_v24 = vmul.f32 0.5, %v991_v23 }
 0x8d1   :  { %v993_v25 = vsub.f32 1.5, %v992_v24 }
 0x8d2   :  { %v2406_v26 = vpop.eup %2405 }
 0x8d3   :  { %v994_v27 = vmul.f32 %v2404_v20, %v993_v25  ;;  %v1000_v28 = vmul.f32 %v2406_v26, %v988_v21  ;;  %vm1006_vm1 = vweird.f32 %v2406_v26 }
 0x8d4   :  { %vm1007_vm8 = vmor %vm1005_vm7, %vm1006_vm1  ;;  %vm1821_vm1 = vcmask 253952  }
 0x8d5   :  { %v1001_v29 = vmul.f32 %v2406_v26, %v1000_v28  ;;  %v998_v30 = vsel %vm997_vm0, %v2404_v20, %v994_v27 }
 0x8d6   :  { %v1009_v34 = vmul.f32 %v998_v30, %v975_v6 }
 0x8d7   :  { %v1002_v31 = vmul.f32 0.5, %v1001_v29 }
 0x8d8   :  { %v1013_v49 = vmul.f32 %v2349_v33, %v1009_v34 }
 0x8d9   :  { %v1003_v32 = vsub.f32 1.5, %v1002_v31 }
 0x8da   :  { %v2796_v42 = vadd.f32 %v2350_v39, %v1013_v49 }
 0x8db   :  { %v1004_v35 = vmul.f32 %v2406_v26, %v1003_v32 }
 0x8dd   :  { %v1008_v38 = vsel %vm1007_vm8, %v2406_v26, %v1004_v35  ;;  %vm1817_vm8 = vcmask 261127  }
 0x8de   :  { %v1010_v40 = vmul.f32 %v1008_v38, %v976_v11 }
 0x8e0   :  { %v1014_v41 = vmul.f32 %v2349_v33, %v1010_v40 }
 0x8e2   :  { %v2798_v43 = vadd.f32 %v2350_v39, %v1014_v41 }
 0x8e4   :  { %v1023_v45 = vpack.c.bf16 %v2798_v43, %v2796_v42 }
 0x8e6   :  { %2149 = vmatmul.msk.bf16.vlgmr.msra.gmra.mxu0 %vm128_vm3, %v1023_v45 }
 0x963   :  { %v1050_v47 = vpop.f32.mrf.mxu0 }
 0x964   :  { %v1051_v48 = vadd.f32 %v2351_v46, %v1050_v47 }
 0x966   :  { %v1055_v51 = vpack.c.bf16 %v1051_v48, %v1051_v48 }
 0x968   :  { %v1058_v52 = vunpack.c.l.b16 %v1055_v51 }
 0x96a   :  { %v2803_v53 = vpack.c.b16 %v1058_v52, %v1058_v52 }
 0x96b   :  { %v1052_v54 = vpop.f32.mrf.mxu0 }
 0x96c   :  { %v1053_v55 = vadd.f32 %v2351_v46, %v1052_v54  ;;  %1060 = vrot.lane.b32.xlu2 %v2803_v53, %s2562_s3 }
 0x96e   :  { %v1056_v56 = vpack.c.bf16 %v1053_v55, %v1053_v55 }
 0x970   :  { %v1082_v57 = vunpack.c.l.b16 %v1056_v56 }
 0x972   :  { %v2807_v58 = vpack.c.b16 %v1082_v57, %v1082_v57 }
 0x974   :  { %1198 = vrot.lane.b32.xlu0 %v2807_v58, %s2561_s2  ;;  %1084 = vrot.lane.b32.xlu1 %v2807_v58, %s2562_s3 }
 0x975   :  { %1175 = vrot.lane.b32.xlu2 %v2803_v53, %s2561_s2 }
 0x97c   :  { %1196 = vrot.lane.b32.xlu0 %v2807_v58, %s2563_s11  ;;  %1312 = vrot.lane.b32.xlu1 %v2807_v58, %s2564_s12 }
 0x97d   :  { %1310 = vrot.lane.b32.xlu2 %v2807_v58, %s2565_s13 }
 0x984   :  { %1289 = vrot.lane.b32.xlu1 %v2803_v53, %s2564_s12  ;;  %1173 = vrot.lane.b32.xlu0 %v2803_v53, %s2563_s11 }
 0x985   :  { %1287 = vrot.lane.b32.xlu2 %v2803_v53, %s2565_s13 }
 0x98c   :  { %1424 = vrot.lane.b32.xlu1 %v2807_v58, %s2567_s15  ;;  %1426 = vrot.lane.b32.xlu0 %v2807_v58, %s2566_s14 }
 0x98d   :  { %1401 = vrot.lane.b32.xlu2 %v2803_v53, %s2567_s15 }
 0x994   :  { %1403 = vrot.lane.b32.xlu0 %v2803_v53, %s2566_s14 }
 0x99c   :  { %1152 = vrot.lane.b32.xlu0 %v2807_v58, %s2558_s7 }
 0x9c6   :  { %v1061_v59 = vpop.permute.xlu2 %1060 }
 0x9c7   :  { %v1066_v60 = vsel %vm263_vm4, %v1061_v59, 0 }
 0x9c8   :  { %1075 = vmatpush.bf16.xpose.msra.mxu2 %v1066_v60 }
 0x9cf   :  { %2150 = vmatmul.msk.bf16.vlgmr.msra.gmra.mxu2 %vm263_vm4, %v1055_v51  ;;  %v1176_v61 = vpop.permute.xlu2 %1175 }
 0x9d0   :  { %v1181_v2 = vsel %vm263_vm4, %v1176_v61, 0 }
 0x9d7   :  { %v1311_v8 = vpop.permute.xlu2 %1310 }
 0x9df   :  { %v1288_v13 = vpop.permute.xlu2 %1287 }
 0x9e6   :  { %v1199_v62 = vpop.permute.xlu0 %1198  ;;  %v1085_v63 = vpop.permute.xlu1 %1084 }
 0x9e7   :  { %v1204_v0 = vsel %vm263_vm4, %v1199_v62, 0  ;;  %v1090_v36 = vsel %vm263_vm4, %v1085_v63, 0  ;;  %v1402_v17 = vpop.permute.xlu2 %1401 }
 0x9e8   :  { %1099 = vmatpush.bf16.xpose.msra.mxu1 %v1090_v36  ;;  %1213 = vmatpush.bf16.xpose.msra.mxu3 %v1204_v0 }
 0x9ee   :  { %v1197_v3 = vpop.permute.xlu0 %1196  ;;  %v1313_v4 = vpop.permute.xlu1 %1312 }
 0x9ef   :  { %v1318_v37 = vsel %vm263_vm4, %v1313_v4, 0  ;;  %2151 = vmatmul.msk.bf16.vlgmr.msra.gmra.mxu1 %vm263_vm4, %v1056_v56  ;;  %2155 = vmatmul.msk.bf16.vlgmr.msra.gmra.mxu3 %vm263_vm4, %v1197_v3 }
 0x9f0   :  { %1190 = vmatpush.bf16.xpose.msrb.mxu1 %v1181_v2  ;;  %1327 = vmatpush.bf16.xpose.msrb.mxu3 %v1318_v37 }
 0x9f6   :  { %v1290_v5 = vpop.permute.xlu1 %1289  ;;  %v1174_v6 = vpop.permute.xlu0 %1173 }
 0x9f7   :  { %v1295_v7 = vsel %vm263_vm4, %v1290_v5, 0 }
 0x9f8   :  { %1304 = vmatpush.bf16.xpose.msra.mxu1 %v1295_v7 }
 0x9fe   :  { %v1427_v9 = vpop.permute.xlu0 %1426  ;;  %v1425_v14 = vpop.permute.xlu1 %1424 }
 0x9ff   :  { %v1432_v10 = vsel %vm263_vm4, %v1427_v9, 0  ;;  %2154 = vmatmul.msk.bf16.vlgmr.msrb.gmra.mxu1 %vm263_vm4, %v1174_v6  ;;  %2159 = vmatmul.msk.bf16.vlgmr.msrb.gmra.mxu3 %vm263_vm4, %v1311_v8 }
 0xa00   :  { %1441 = vmatpush.bf16.xpose.msra.mxu3 %v1432_v10 }
 0xa06   :  { %v1404_v11 = vpop.permute.xlu0 %1403 }
 0xa07   :  { %v1409_v12 = vsel %vm263_vm4, %v1404_v11, 0 }
 0xa08   :  { %1418 = vmatpush.bf16.xpose.msrb.mxu1 %v1409_v12 }
 0xa0e   :  { %v1153_v15 = vpop.permute.xlu0 %1152 }
 0xa0f   :  { %v1158_v16 = vsel %vm338_vm5, %v1153_v15, 0  ;;  %2158 = vmatmul.msk.bf16.vlgmr.msra.gmra.mxu1 %vm263_vm4, %v1288_v13  ;;  %2163 = vmatmul.msk.bf16.vlgmr.msra.gmra.mxu3 %vm263_vm4, %v1425_v14 }
 0xa10   :  { %1167 = vmatpush.bf16.msrb.mxu2 %v1158_v16 }
 0xa1f   :  { %2162 = vmatmul.msk.bf16.vlgmr.msrb.gmra.mxu1 %vm263_vm4, %v1402_v17 }
 0xa52   :  { %v1077_v18 = vpop.f32.mrf.mxu2 }
 0xa53   :  { %v1105_v19 = vmul.f32 0.35355338, %v1077_v18 }
 0xa55   :  { %v1107_v44 = vsel %vm263_vm4, %v1105_v19, -inf }
 0xa56   :  { %1108 = vmax.xlane.f32.xlu0 %v1107_v44 }
 0xa5a   :  { %v1079_v20 = vpop.f32.mrf.mxu2 }
 0xa6c   :  { %v1101_v21 = vpop.f32.mrf.mxu1 }
 0xa6d   :  { %v1106_v22 = vmul.f32 0.35355338, %v1101_v21 }
 0xa6f   :  { %v1110_v23 = vsel %vm263_vm4, %v1106_v22, -inf }
 0xa70   :  { %1111 = vmax.xlane.f32.xlu1 %v1110_v23 }
 0xa72   :  { %v1215_v24 = vpop.f32.mrf.mxu3 }
 0xa73   :  { %v1220_v25 = vmul.f32 0.35355338, %v1215_v24 }
 0xa74   :  { %v1103_v26 = vpop.f32.mrf.mxu1 }
 0xa75   :  { %v1224_v27 = vsel %vm263_vm4, %v1220_v25, -inf }
 0xa76   :  { %1225 = vmax.xlane.f32.xlu2 %v1224_v27 }
 0xa7a   :  { %v1217_v28 = vpop.f32.mrf.mxu3 }
 0xa7c   :  { %v1192_v29 = vpop.f32.mrf.mxu1 }
 0xa7d   :  { %v1219_v30 = vmul.f32 0.35355338, %v1192_v29 }
 0xa7f   :  { %v1221_v31 = vsel %vm263_vm4, %v1219_v30, -inf }
 0xa80   :  { %1222 = vmax.xlane.f32.xlu1 %v1221_v31 }
 0xa82   :  { %v1329_v32 = vpop.f32.mrf.mxu3 }
 0xa83   :  { %v1334_v33 = vmul.f32 0.35355338, %v1329_v32 }
 0xa84   :  { %v1194_v34 = vpop.f32.mrf.mxu1 }
 0xa85   :  { %v1338_v35 = vsel %vm263_vm4, %v1334_v33, -inf }
 0xa86   :  { %1339 = vmax.xlane.f32.xlu0 %v1338_v35 }
 0xa8a   :  { %v1331_v38 = vpop.f32.mrf.mxu3 }
 0xa8c   :  { %v1306_v39 = vpop.f32.mrf.mxu1 }
 0xa8d   :  { %v1333_v49 = vmul.f32 0.35355338, %v1306_v39 }
 0xa8f   :  { %v1335_v40 = vsel %vm263_vm4, %v1333_v49, -inf }
 0xa90   :  { %1336 = vmax.xlane.f32.xlu2 %v1335_v40 }
 0xa92   :  { %v1443_v41 = vpop.f32.mrf.mxu3 }
 0xa93   :  { %v2860_v45 = vmul.f32 0.35355338, %v1443_v41 }
 0xa94   :  { %v1308_v46 = vpop.f32.mrf.mxu1 }
 0xa95   :  { %v1452_v47 = vsel %vm263_vm4, %v2860_v45, -inf }
 0xa96   :  { %1453 = vmax.xlane.f32.xlu1 %v1452_v47 }
 0xa9a   :  { %v1445_v48 = vpop.f32.mrf.mxu3 }
 0xa9c   :  { %v1420_v51 = vpop.f32.mrf.mxu1 }
 0xa9d   :  { %v1447_v52 = vmul.f32 0.35355338, %v1420_v51 }
 0xa9f   :  { %v1449_v54 = vsel %vm263_vm4, %v1447_v52, -inf }
 0xaa0   :  { %1450 = vmax.xlane.f32.xlu2 %v1449_v54 }
 0xaa4   :  { %v1422_v55 = vpop.f32.mrf.mxu1 }
 0xab8   :  { %1131 = vrot.lane.b32.xlu2 %v2803_v53, %s2558_s7 }
 0xac9   :  { %v1109_v56 = vpop.xlane.xlu0 %1108 }
 0xaca   :  { %v1113_v57 = vsub.f32 %v1105_v19, %v1109_v56 }
 0xacc   :  { %v1115_v59 = vmul.f32 1.442695, %v1113_v57 }
 0xace   :  { %2407 = vpow2.f32 %v1115_v59 }
 0xad4   :  { %v2408_v60 = vpop.eup %2407 }
 0xad5   :  { %v1119_v61 = vsel %vm263_vm4, %v2408_v60, 0.0 }
 0xad6   :  { %1120 = vadd.xlane.f32.xlu1 %v1119_v61 }
 0xae3   :  { %v1112_v62 = vpop.xlane.xlu1 %1111 }
 0xae4   :  { %v1114_v63 = vsub.f32 %v1106_v22, %v1112_v62 }
 0xae6   :  { %v1117_v0 = vmul.f32 1.442695, %v1114_v63 }
 0xae8   :  { %2409 = vpow2.f32 %v1117_v0 }
 0xae9   :  { %v1226_v5 = vpop.xlane.xlu2 %1225 }
 0xaea   :  { %v1228_v9 = vsub.f32 %v1220_v25, %v1226_v5 }
 0xaec   :  { %v1231_v10 = vmul.f32 1.442695, %v1228_v9 }
 0xaee   :  { %v2868_v36 = vpop.eup %2409 }
 0xaef   :  { %1245 = vrot.lane.b32.xlu1 %v2803_v53, %s2568_s16  ;;  %v1122_v2 = vsel %vm263_vm4, %v2868_v36, 0.0 }
 0xaf0   :  { %1123 = vadd.xlane.f32.xlu0 %v1122_v2 }
 0xaf3   :  { %v1223_v12 = vpop.xlane.xlu1 %1222 }
 0xaf4   :  { %v1227_v15 = vsub.f32 %v1219_v30, %v1223_v12 }
 0xaf6   :  { %v1229_v16 = vmul.f32 1.442695, %v1227_v15 }
 0xaf7   :  { %1380 = vrot.lane.b32.xlu1 %v2807_v58, %s2569_s17 }
 0xaf9   :  { %v1340_v3 = vpop.xlane.xlu0 %1339 }
 0xafa   :  { %v1342_v4 = vsub.f32 %v1334_v33, %v1340_v3 }
 0xafc   :  { %v1345_v37 = vmul.f32 1.442695, %v1342_v4 }
 0xafe   :  { %2411 = vpow2.f32 %v1345_v37 }
 0xaff   :  { %2413 = vpow2.f32 %v1231_v10 }
 0xb03   :  { %v1337_v8 = vpop.xlane.xlu2 %1336 }
 0xb04   :  { %v2876_v6 = vpop.eup %2411  ;;  %1266 = vrot.lane.b32.xlu0 %v2807_v58, %s2568_s16  ;;  %v1341_v18 = vsub.f32 %v1333_v49, %v1337_v8 }
 0xb05   :  { %v1350_v7 = vsel %vm263_vm4, %v2876_v6, 0.0  ;;  %v2414_v44 = vpop.eup %2413 }
 0xb06   :  { %1351 = vadd.xlane.f32.xlu2 %v1350_v7  ;;  %v1343_v22 = vmul.f32 1.442695, %v1341_v18  ;;  %v1236_v23 = vsel %vm263_vm4, %v2414_v44, 0.0 }
 0xb09   :  { %v1454_v28 = vpop.xlane.xlu1 %1453 }
 0xb0a   :  { %v1456_v33 = vsub.f32 %v2860_v45, %v1454_v28 }
 0xb0c   :  { %v1459_v34 = vmul.f32 1.442695, %v1456_v33 }
 0xb13   :  { %v1451_v11 = vpop.xlane.xlu2 %1450 }
 0xb14   :  { %v1455_v13 = vsub.f32 %v1447_v52, %v1451_v11 }
 0xb16   :  { %v1457_v14 = vmul.f32 1.442695, %v1455_v13 }
 0xb18   :  { %2415 = vpow2.f32 %v1457_v14 }
 0xb19   :  { %2417 = vpow2.f32 %v1229_v16 }
 0xb1a   :  { %2419 = vpow2.f32 %v1343_v22 }
 0xb1b   :  { %v1132_v17 = vpop.permute.xlu2 %1131 }
 0xb1c   :  { %v1137_v19 = vsel %vm338_vm5, %v1132_v17, 0 }
 0xb1d   :  { %1146 = vmatpush.bf16.msrb.mxu0 %v1137_v19 }
 0xb1e   :  { %v2883_v20 = vpop.eup %2415 }
 0xb1f   :  { %v1461_v21 = vsel %vm263_vm4, %v2883_v20, 0.0  ;;  %v2418_v24 = vpop.eup %2417 }
 0xb20   :  { %1462 = vadd.xlane.f32.xlu2 %v1461_v21  ;;  %v1233_v25 = vsel %vm263_vm4, %v2418_v24, 0.0  ;;  %v2420_v26 = vpop.eup %2419 }
 0xb21   :  { %1237 = vadd.xlane.f32.xlu1 %v1236_v23  ;;  %v1347_v27 = vsel %vm263_vm4, %v2420_v26, 0.0 }
 0xb29   :  { %1234 = vadd.xlane.f32.xlu1 %v1233_v25 }
 0xb2e   :  { %1348 = vadd.xlane.f32.xlu0 %v1347_v27 }
 0xb38   :  { %1473 = vrot.lane.b32.xlu2 %v2803_v53, %s2570_s18 }
 0xb42   :  { %1359 = vrot.lane.b32.xlu1 %v2803_v53, %s2569_s17  ;;  %1494 = vrot.lane.b32.xlu0 %v2807_v58, %s2570_s18 }
 0xb49   :  { %v1121_v29 = vpop.xlane.xlu1 %1120 }
 0xb4a   :  { %2421 = vrcp.f32 %v1121_v29 }
 0xb4b   :  { %2423 = vpow2.f32 %v1459_v34 }
 0xb50   :  { %v2422_v30 = vpop.eup %2421 }
 0xb51   :  { %v1127_v31 = vmul.f32 %v2422_v30, %v2408_v60  ;;  %v2424_v53 = vpop.eup %2423 }
 0xb52   :  { %v1464_v40 = vsel %vm263_vm4, %v2424_v53, 0.0 }
 0xb53   :  { %v1129_v32 = vpack.c.bf16 %v1127_v31, %v1127_v31 }
 0xb55   :  { %2152 = vmatmul.msk.bf16.vlgmr.msrb.gmra.mxu0 %vm263_vm4, %v1129_v32 }
 0xb61   :  { %v1246_v35 = vpop.permute.xlu1 %1245 }
 0xb62   :  { %v1251_v38 = vsel %vm338_vm5, %v1246_v35, 0 }
 0xb63   :  { %v1124_v39 = vpop.xlane.xlu0 %1123  ;;  %1260 = vmatpush.bf16.msra.mxu0 %v1251_v38  ;;  %v2266_v38 = vld [vmem:[#allocation6 + $0xb8] sm:$0xff] }
 0xb64   :  { %2425 = vrcp.f32 %v1124_v39  ;;  %1573 = vmatpush.bf16.msra.mxu1 %v2266_v38  ;;  %v2265_v39 = vld [vmem:[#allocation6 + $0xb0] sm:$0xff] }
 0xb68   :  { %1574 = vmatpush.bf16.msra.mxu1 %v2265_v39 }
 0xb69   :  { %v1381_v46 = vpop.permute.xlu1 %1380 }
 0xb6a   :  { %v2426_v49 = vpop.eup %2425  ;;  %v1386_v48 = vsel %vm338_vm5, %v1381_v46, 0 }
 0xb6b   :  { %v1128_v58 = vmul.f32 %v2426_v49, %v2868_v36 }
 0xb6c   :  { %1465 = vadd.xlane.f32.xlu1 %v1464_v40 }
 0xb6d   :  { %v1130_v41 = vpack.c.bf16 %v1128_v58, %v1128_v58 }
 0xb6f   :  { %2153 = vmatmul.msk.bf16.vlgmr.msrb.gmra.mxu2 %vm263_vm4, %v1130_v41 }
 0xb76   :  { %v1267_v45 = vpop.permute.xlu0 %1266 }
 0xb77   :  { %v1272_v47 = vsel %vm338_vm5, %v1267_v45, 0 }
 0xb78   :  { %1281 = vmatpush.bf16.msra.mxu2 %v1272_v47 }
 0xb79   :  { %v1352_v56 = vpop.xlane.xlu2 %1351 }
 0xb7c   :  { %1395 = vmatpush.bf16.msrb.mxu2 %v1386_v48 }
 0xb93   :  { %v1463_v0 = vpop.xlane.xlu2 %1462 }
 0xb94   :  { %v1238_v51 = vpop.xlane.xlu1 %1237 }
 0xb95   :  { %2427 = vrcp.f32 %v1238_v51 }
 0xb9b   :  { %v2428_v52 = vpop.eup %2427  ;;  %v1474_v4 = vpop.permute.xlu2 %1473 }
 0xb9c   :  { %v1242_v54 = vmul.f32 %v2428_v52, %v2414_v44  ;;  %v1235_v55 = vpop.xlane.xlu1 %1234  ;;  %v1479_v10 = vsel %vm338_vm5, %v1474_v4, 0 }
 0xb9d   :  { %2429 = vrcp.f32 %v1235_v55 }
 0xb9e   :  { %v1244_v57 = vpack.c.bf16 %v1242_v54, %v1242_v54  ;;  %2431 = vrcp.f32 %v1352_v56 }
 0xba0   :  { %2157 = vmatmul.msk.bf16.vlgmr.msra.gmra.mxu2 %vm263_vm4, %v1244_v57 }
 0xba1   :  { %v1349_v63 = vpop.xlane.xlu0 %1348 }
 0xba2   :  { %2433 = vrcp.f32 %v1349_v63 }
 0xba3   :  { %v2430_v59 = vpop.eup %2429  ;;  %2435 = vrcp.f32 %v1463_v0 }
 0xba4   :  { %v1241_v60 = vmul.f32 %v2430_v59, %v2418_v24  ;;  %v2432_v62 = vpop.eup %2431 }
 0xba5   :  { %v1356_v36 = vmul.f32 %v2432_v62, %v2876_v6 }
 0xba6   :  { %v1243_v61 = vpack.c.bf16 %v1241_v60, %v1241_v60  ;;  %v2352_v60 = vld [vmem:[#allocation7 + $0x10d] ss:$0 sm:$0xff] }
 0xba7   :  { %v1358_v2 = vpack.c.bf16 %v1356_v36, %v1356_v36 }
 0xba8   :  { %2156 = vmatmul.msk.bf16.vlgmr.msra.gmra.mxu0 %vm263_vm4, %v1243_v61  ;;  %v2434_v3 = vpop.eup %2433 }
 0xba9   :  { %v1355_v37 = vmul.f32 %v2434_v3, %v2420_v26  ;;  %v2436_v6 = vpop.eup %2435 }
 0xbaa   :  { %v1469_v12 = vmul.f32 %v2436_v6, %v2883_v20 }
 0xbab   :  { %v1357_v11 = vpack.c.bf16 %v1355_v37, %v1355_v37 }
 0xbac   :  { %v1471_v13 = vpack.c.bf16 %v1469_v12, %v1469_v12 }
 0xbb0   :  { %2161 = vmatmul.msk.bf16.vlgmr.msrb.gmra.mxu2 %vm263_vm4, %v1358_v2 }
 0xbb4   :  { %v1360_v5 = vpop.permute.xlu1 %1359  ;;  %v1495_v7 = vpop.permute.xlu0 %1494 }
 0xbb5   :  { %v1365_v8 = vsel %vm338_vm5, %v1360_v5, 0  ;;  %v1500_v9 = vsel %vm338_vm5, %v1495_v7, 0 }
 0xbb6   :  { %1374 = vmatpush.bf16.msrb.mxu0 %v1365_v8  ;;  %1509 = vmatpush.bf16.msra.mxu2 %v1500_v9 }
 0xbb9   :  { %2160 = vmatmul.msk.bf16.vlgmr.msrb.gmra.mxu0 %vm263_vm4, %v1357_v11 }
 0xbba   :  { %1488 = vmatpush.bf16.msra.mxu0 %v1479_v10 }
 0xbc9   :  { %2164 = vmatmul.msk.bf16.vlgmr.msra.gmra.mxu0 %vm263_vm4, %v1471_v13 }
 0xbd2   :  { %v1148_v14 = vpop.f32.mrf.mxu0 }
 0xbda   :  { %v1150_v15 = vpop.f32.mrf.mxu0 }
 0xbdf   :  { %v1466_v16 = vpop.xlane.xlu1 %1465 }
 0xbe0   :  { %2437 = vrcp.f32 %v1466_v16  ;;  %v2267_v16 = vld [vmem:[#allocation6 + $0xc0] sm:$0xff] }
 0xbe6   :  { %v2438_v17 = vpop.eup %2437 }
 0xbe7   :  { %v1470_v18 = vmul.f32 %v2438_v17, %v2424_v53  ;;  %v2276_v17 = vld [vmem:[#allocation6 + $0x108] sm:$0xff] }
 0xbe8   :  { %1740 = vmatpush.bf16.msrb.mxu0 %v2276_v17 }
 0xbe9   :  { %v1472_v19 = vpack.c.bf16 %v1470_v18, %v1470_v18 }
 0xbeb   :  { %2165 = vmatmul.msk.bf16.vlgmr.msra.gmra.mxu2 %vm263_vm4, %v1472_v19 }
 0xbf2   :  { %v1169_v44 = vpop.f32.mrf.mxu2 }
 0xbfa   :  { %v1171_v21 = vpop.f32.mrf.mxu2 }
 0xc23   :  { %v1283_v22 = vpop.f32.mrf.mxu2 }
 0xc25   :  { %v1262_v23 = vpop.f32.mrf.mxu0 }
 0xc26   :  { %v2321_v24 = vpack.i.bf16 %v1283_v22, %v1262_v23 }
 0xc28   :  { %2322 = vrot.lane.b32.xlu0 %v2321_v24, %s2555_s24  ;;  %v2274_v24 = vld [vmem:[#allocation6 + $0xf8] sm:$0xff] }
 0xc2b   :  { %v1285_v20 = vpop.f32.mrf.mxu2 }
 0xc2d   :  { %v1264_v25 = vpop.f32.mrf.mxu0 }
 0xc33   :  { %v1397_v26 = vpop.f32.mrf.mxu2 }
 0xc36   :  { %v1376_v27 = vpop.f32.mrf.mxu0 }
 0xc37   :  { %v2326_v28 = vpack.i.bf16 %v1397_v26, %v1376_v27  ;;  %v2273_v26 = vld [vmem:[#allocation6 + $0xf0] sm:$0xff] }
 0xc39   :  { %2327 = vrot.lane.b32.xlu2 %v2326_v28, %s2571_s19 }
 0xc3b   :  { %v1399_v29 = vpop.f32.mrf.mxu2 }
 0xc3e   :  { %v1378_v30 = vpop.f32.mrf.mxu0 }
 0xc46   :  { %v1490_v31 = vpop.f32.mrf.mxu0 }
 0xc4e   :  { %v1492_v32 = vpop.f32.mrf.mxu0 }
 0xc6e   :  { %v1511_v33 = vpop.f32.mrf.mxu2 }
 0xc6f   :  { %v2331_v34 = vpack.i.bf16 %v1511_v33, %v1490_v31 }
 0xc71   :  { %2332 = vrot.lane.b32.xlu0 %v2331_v34, %s2572_s20 }
 0xc76   :  { %v1513_v35 = vpop.f32.mrf.mxu2 }
 0xc77   :  { %v2353_v35 = vld [vmem:[#allocation7 + $0x10e] ss:$0 sm:$0xff] }
 0xc93   :  { %v2328_v40 = vpop.permute.xlu2 %2327 }
 0xc94   :  { %v2330_v45 = vunpack.i.h.bf16 %v2328_v40  ;;  %v2329_v47 = vunpack.i.l.bf16 %v2328_v40 }
 0xc9a   :  { %v2323_v53 = vpop.permute.xlu0 %2322 }
 0xc9b   :  { %v2325_v49 = vunpack.i.h.bf16 %v2323_v53  ;;  %v2324_v58 = vunpack.i.l.bf16 %v2323_v53 }
 0xc9d   :  { %v1540_v41 = vsel %vm263_vm4, %v1169_v44, %v2325_v49  ;;  %v1539_v46 = vsel %vm263_vm4, %v1148_v14, %v2324_v58  ;;  %v2275_v44 = vld [vmem:[#allocation6 + $0x100] sm:$0xff]  ;;  %v2354_v49 = vld [vmem:[#allocation7 + $0x10f] ss:$0 sm:$0xff] }
 0xc9e   :  { %v1541_v54 = vsel %vm91_vm2, %v1539_v46, %v2329_v47  ;;  %v1542_v55 = vsel %vm91_vm2, %v1540_v41, %v2330_v45  ;;  %1741 = vmatpush.bf16.msrb.mxu0 %v2275_v44 }
 0xca2   :  { %1742 = vmatpush.bf16.msrb.mxu0 %v2274_v24 }
 0xca6   :  { %1743 = vmatpush.bf16.msrb.mxu0 %v2273_v26 }
 0xce3   :  { %v2333_v48 = vpop.permute.xlu0 %2332 }
 0xce4   :  { %v2335_v51 = vunpack.i.h.bf16 %v2333_v48  ;;  %v2334_v52 = vunpack.i.l.bf16 %v2333_v48  ;;  %v2272_v48 = vld [vmem:[#allocation6 + $0xe8] sm:$0xff] }
 0xce5   :  { %1744 = vmatpush.bf16.msrb.mxu0 %v2272_v48 }
 0xce6   :  { %v1543_v56 = vsel %vm746_vm6, %v1541_v54, %v2334_v52  ;;  %v1544_v57 = vsel %vm746_vm6, %v1542_v55, %v2335_v51  ;;  %v2271_v51 = vld [vmem:[#allocation6 + $0xe0] sm:$0xff]  ;;  %v2270_v52 = vld [vmem:[#allocation6 + $0xd8] sm:$0xff]  ;;  %v2269_v54 = vld [vmem:[#allocation6 + $0xd0] sm:$0xff] }
 0xce7   :  { %v1549_v59 = vpack.c.bf16 %v1544_v57, %v1543_v56  ;;  %v2355_v56 = vld [vmem:[#allocation7 + $0x110] ss:$0 sm:$0xff] }
 0xce9   :  { %2174 = vmatmul.msk.bf16.vlgmr.msra.gmra.mxu1 %vm128_vm3, %v1549_v59  ;;  %1745 = vmatpush.bf16.msrb.mxu0 %v2271_v51  ;;  %v2574_v51 = vmov 0  }
 0xcea   :  { %2336 = vset.pattern.permute.xlu2 %v2574_v51  ;;  %2337 = vset.pattern.permute.xlu1 %v2574_v51 }
 0xceb   :  { %2338 = vset.pattern.permute.xlu0 %v2574_v51 }
 0xced   :  { %1746 = vmatpush.bf16.msrb.mxu0 %v2270_v52  ;;  %v2575_v52 = vmov 64.0  }
 0xcf1   :  { %1747 = vmatpush.bf16.msrb.mxu0 %v2269_v54 }
 0xd66   :  { %v1576_v61 = vpop.f32.mrf.mxu1 }
 0xd67   :  { %v1577_v62 = vadd.f32 %v2352_v60, %v1576_v61 }
 0xd69   :  { %v1581_v63 = vadd.f32 %v1577_v62, %v2796_v42 }
 0xd6b   :  { %v1583_v0 = vsel %vm128_vm3, %v1581_v63, 0.0 }
 0xd6c   :  { %1584 = vadd.xlane.f32.xlu1 %v1583_v0 }
 0xd6e   :  { %v1578_v36 = vpop.f32.mrf.mxu1 }
 0xd6f   :  { %v1579_v2 = vadd.f32 %v2352_v60, %v1578_v36  ;;  %v2356_v36 = vld [vmem:[#allocation7 + $0x111] ss:$0 sm:$0xff] }
 0xd71   :  { %v1582_v3 = vadd.f32 %v1579_v2, %v2798_v43  ;;  %v2268_v43 = vld [vmem:[#allocation6 + $0xc8] sm:$0xff] }
 0xd72   :  { %1663 = vmatpush.bf16.msrb.mxu3 %v2268_v43 }
 0xd73   :  { %v1586_v4 = vsel %vm128_vm3, %v1582_v3, 0.0 }
 0xd74   :  { %1587 = vadd.xlane.f32.xlu2 %v1586_v4 }
 0xd76   :  { %1664 = vmatpush.bf16.msrb.mxu3 %v2267_v16 }
 0xddf   :  { %v1585_v37 = vpop.xlane.xlu1 %1584 }
 0xde0   :  { %v1589_v5 = vmul.f32 %v1585_v37, %v2779_v1 }
 0xde2   :  { %v1591_v7 = vsub.f32 %v1581_v63, %v1589_v5 }
 0xde4   :  { %v1593_v8 = vmul.f32 %v1591_v7, %v1591_v7 }
 0xde6   :  { %v1595_v9 = vsel %vm128_vm3, %v1593_v8, 0.0 }
 0xde7   :  { %v1588_v10 = vpop.xlane.xlu2 %1587  ;;  %1596 = vadd.xlane.f32.xlu0 %v1595_v9 }
 0xde8   :  { %v1590_v42 = vmul.f32 %v1588_v10, %v2779_v1 }
 0xdea   :  { %v1592_v11 = vsub.f32 %v1582_v3, %v1590_v42 }
 0xdec   :  { %v1594_v6 = vmul.f32 %v1592_v11, %v1592_v11 }
 0xdee   :  { %v1598_v12 = vsel %vm128_vm3, %v1594_v6, 0.0 }
 0xdef   :  { %1599 = vadd.xlane.f32.xlu1 %v1598_v12 }
 0xe5a   :  { %v1597_v13 = vpop.xlane.xlu0 %1596 }
 0xe5b   :  { %v1601_v14 = vmul.f32 %v1597_v13, %v2779_v1 }
 0xe5d   :  { %v1603_v15 = vadd.f32 1e-05, %v1601_v14 }
 0xe5f   :  { %2439 = vrsqrt.f32 %v1603_v15  ;;  %vm1611_vm4 = vweird.f32 %v1603_v15 }
 0xe62   :  { %v1600_v18 = vpop.xlane.xlu1 %1599 }
 0xe63   :  { %v1602_v19 = vmul.f32 %v1600_v18, %v2779_v1 }
 0xe65   :  { %v2440_v21 = vpop.eup %2439  ;;  %v1604_v22 = vadd.f32 1e-05, %v1602_v19 }
 0xe66   :  { %v1606_v23 = vmul.f32 %v2440_v21, %v1603_v15  ;;  %vm1612_vm2 = vweird.f32 %v2440_v21  ;;  %v2343_v15 = vld [vmem:[#allocation7 + $0x101] ss:$0 sm:$0xff] }
 0xe67   :  { %2441 = vrsqrt.f32 %v1604_v22  ;;  %vm1613_vm5 = vmor %vm1611_vm4, %vm1612_vm2  ;;  %vm1621_vm9 = vweird.f32 %v1604_v22  ;;  %v2943_v17 = vadd.f32 %v2343_v15, %v2659_v50  ;;  %vm1827_vm2 = vcmask 1040384  }
 0xe68   :  { %v1607_v20 = vmul.f32 %v2440_v21, %v1606_v23 }
 0xe69   :  { %v1809_v18 = vsel %vm1808_vm11, %v2943_v17, 0.0 }
 0xe6a   :  { %v1608_v25 = vmul.f32 0.5, %v1607_v20 }
 0xe6c   :  { %v1609_v27 = vsub.f32 1.5, %v1608_v25 }
 0xe6d   :  { %v2442_v28 = vpop.eup %2441 }
 0xe6e   :  { %v1610_v29 = vmul.f32 %v2440_v21, %v1609_v27  ;;  %v1616_v30 = vmul.f32 %v2442_v28, %v1604_v22  ;;  %vm1622_vm6 = vweird.f32 %v2442_v28 }
 0xe6f   :  { %vm1623_vm10 = vmor %vm1621_vm9, %vm1622_vm6 }
 0xe70   :  { %v1617_v31 = vmul.f32 %v2442_v28, %v1616_v30  ;;  %v1614_v32 = vsel %vm1613_vm5, %v2440_v21, %v1610_v29 }
 0xe71   :  { %v1625_v38 = vmul.f32 %v1614_v32, %v1591_v7 }
 0xe72   :  { %v1618_v33 = vmul.f32 0.5, %v1617_v31  ;;  %v2357_v31 = vld [vmem:[#allocation7 + $0x112] ss:$0 sm:$0xff] }
 0xe73   :  { %v1629_v58 = vmul.f32 %v2353_v35, %v1625_v38 }
 0xe74   :  { %v1619_v34 = vsub.f32 1.5, %v1618_v33 }
 0xe75   :  { %v1633_v46 = vadd.f32 %v2354_v49, %v1629_v58 }
 0xe76   :  { %v1620_v39 = vmul.f32 %v2442_v28, %v1619_v34 }
 0xe78   :  { %v1624_v53 = vsel %vm1623_vm10, %v2442_v28, %v1620_v39  ;;  %vm1932_vm10 = vcmask 1041409  }
 0xe79   :  { %v1626_v40 = vmul.f32 %v1624_v53, %v1592_v11 }
 0xe7b   :  { %v1630_v41 = vmul.f32 %v2353_v35, %v1626_v40  ;;  %v2358_v35 = vld [vmem:[#allocation7 + $0x113] ss:$0 sm:$0xff] }
 0xe7d   :  { %v1634_v45 = vadd.f32 %v2354_v49, %v1630_v41 }
 0xe7f   :  { %v1639_v47 = vpack.c.bf16 %v1634_v45, %v1633_v46 }
 0xe81   :  { %2183 = vmatmul.msk.bf16.vlgmr.msrb.gmra.mxu3 %vm128_vm3, %v1639_v47 }
 0xf04   :  { %v1666_v55 = vpop.f32.mrf.mxu3 }
 0xf05   :  { %v1667_v57 = vadd.f32 %v2355_v56, %v1666_v55 }
 0xf07   :  { %v1671_v61 = vmax.f32 %v1667_v57, 0.0 }
 0xf0c   :  { %v1668_v59 = vpop.f32.mrf.mxu3 }
 0xf0d   :  { %v1669_v60 = vadd.f32 %v2355_v56, %v1668_v59 }
 0xf0f   :  { %v1672_v62 = vmax.f32 %v1669_v60, 0.0 }
 0xf11   :  { %v1689_v63 = vpack.c.bf16 %v1672_v62, %v1671_v61 }
 0xf13   :  { %1748 = vmatmul.bf16.vlgmr.msrb.gmra.mxu0 %v1689_v63 }
 0xf90   :  { %v1749_v0 = vpop.f32.mrf.mxu0 }
 0xf91   :  { %v1750_v37 = vadd.f32 %v2356_v36, %v1749_v0 }
 0xf93   :  { %v1754_v7 = vadd.f32 %v1750_v37, %v1633_v46 }
 0xf95   :  { %v1756_v8 = vsel %vm128_vm3, %v1754_v7, 0.0 }
 0xf98   :  { %v1751_v2 = vpop.f32.mrf.mxu0 }
 0xf99   :  { %v1752_v3 = vadd.f32 %v2356_v36, %v1751_v2 }
 0xf9b   :  { %v1755_v4 = vadd.f32 %v1752_v3, %v1634_v45 }
 0xf9d   :  { %v1759_v5 = vsel %vm128_vm3, %v1755_v4, 0.0 }
 0xf9e   :  { %1760 = vadd.xlane.f32.xlu1 %v1759_v5 }
 0xfa6   :  { %1757 = vadd.xlane.f32.xlu1 %v1756_v8 }
0x1011   :  { %v1761_v9 = vpop.xlane.xlu1 %1760 }
0x1012   :  { %v1763_v10 = vmul.f32 %v1761_v9, %v2779_v1 }
0x1014   :  { %v1765_v42 = vsub.f32 %v1755_v4, %v1763_v10 }
0x1016   :  { %v1767_v11 = vmul.f32 %v1765_v42, %v1765_v42 }
0x1018   :  { %v1771_v6 = vsel %vm128_vm3, %v1767_v11, 0.0 }
0x1019   :  { %1772 = vadd.xlane.f32.xlu1 %v1771_v6  ;;  %v1758_v12 = vpop.xlane.xlu1 %1757 }
0x101a   :  { %v1762_v43 = vmul.f32 %v1758_v12, %v2779_v1 }
0x101c   :  { %v1764_v13 = vsub.f32 %v1754_v7, %v1762_v43 }
0x101e   :  { %v1766_v14 = vmul.f32 %v1764_v13, %v1764_v13 }
0x1020   :  { %v1768_v16 = vsel %vm128_vm3, %v1766_v14, 0.0 }
0x1021   :  { %1769 = vadd.xlane.f32.xlu1 %v1768_v16 }
0x1029   :  { %1810 = vadd.xlane.f32.xlu1 %v1809_v18 }
0x108c   :  { %v1773_v19 = vpop.xlane.xlu1 %1772 }
0x108d   :  { %v1775_v44 = vmul.f32 %v1773_v19, %v2779_v1 }
0x108f   :  { %v1777_v21 = vadd.f32 1e-05, %v1775_v44 }
0x1091   :  { %2443 = vrsqrt.f32 %v1777_v21  ;;  %vm1794_vm13 = vweird.f32 %v1777_v21 }
0x1094   :  { %v1770_v22 = vpop.xlane.xlu1 %1769 }
0x1095   :  { %v1774_v23 = vmul.f32 %v1770_v22, %v2779_v1 }
0x1097   :  { %v2444_v24 = vpop.eup %2443  ;;  %v1776_v20 = vadd.f32 1e-05, %v1774_v23 }
0x1098   :  { %v1789_v25 = vmul.f32 %v2444_v24, %v1777_v21  ;;  %vm1795_vm12 = vweird.f32 %v2444_v24 }
0x1099   :  { %2445 = vrsqrt.f32 %v1776_v20  ;;  %vm1796_vm14 = vmor %vm1794_vm13, %vm1795_vm12  ;;  %vm1784_vm0 = vweird.f32 %v1776_v20 }
0x109a   :  { %v1790_v26 = vmul.f32 %v2444_v24, %v1789_v25  ;;  %2447 = vrcp.f32 %v2575_v52 }
0x109c   :  { %v1791_v50 = vmul.f32 0.5, %v1790_v26  ;;  %v1811_v0 = vpop.xlane.xlu1 %1810 }
0x109e   :  { %v1792_v27 = vsub.f32 1.5, %v1791_v50 }
0x109f   :  { %v2446_v28 = vpop.eup %2445 }
0x10a0   :  { %v1793_v29 = vmul.f32 %v2444_v24, %v1792_v27  ;;  %v1779_v30 = vmul.f32 %v2446_v28, %v1776_v20  ;;  %vm1785_vm15 = vweird.f32 %v2446_v28  ;;  %v2448_v54 = vpop.eup %2447 }
0x10a1   :  { %vm1786_vm7 = vmor %vm1784_vm0, %vm1785_vm15  ;;  %v1834_v55 = vmul.f32 64.0, %v2448_v54  ;;  %vm1838_vm4 = vweird.f32 %v2448_v54 }
0x10a2   :  { %v1797_v32 = vsel %vm1796_vm14, %v2444_v24, %v1793_v29  ;;  %v1780_v33 = vmul.f32 %v2446_v28, %v1779_v30  ;;  %v2278_v29 = vld [vmem:[#allocation6 + $0x118] sm:$0xff]  ;;  %v2277_v30 = vld [vmem:[#allocation6 + $0x110] sm:$0xff] }
0x10a3   :  { %v1799_v34 = vmul.f32 %v1797_v32, %v1765_v42  ;;  %v1835_v56 = vsub.f32 1.0, %v1834_v55  ;;  %1984 = vmatpush.bf16.msrb.mxu1 %v2278_v29  ;;  %v2279_v32 = vld [vmem:[#allocation6 + $0x120] sm:$0xff] }
0x10a4   :  { %v1781_v38 = vmul.f32 0.5, %v1780_v33  ;;  %v2359_v33 = vld [vmem:[#allocation7 + $0x114] ss:$0 sm:$0xff] }
0x10a5   :  { %v1803_v1 = vmul.f32 %v2357_v31, %v1799_v34  ;;  %v1836_v57 = vmul.f32 %v2448_v54, %v1835_v56 }
0x10a6   :  { %v1782_v39 = vsub.f32 1.5, %v1781_v38  ;;  %v2361_v38 = vld [vmem:[#allocation7 + $0x115] ss:$0 sm:$0xff] }
0x10a7   :  { %v1807_v53 = vadd.f32 %v2358_v35, %v1803_v1  ;;  %v1837_v60 = vadd.f32 %v2448_v54, %v1836_v57  ;;  %1985 = vmatpush.bf16.msrb.mxu1 %v2277_v30 }
0x10a8   :  { %v1783_v49 = vmul.f32 %v2446_v28, %v1782_v39 }
0x10a9   :  { %v1814_v58 = vrot.slane %v1807_v53, 7  ;;  %v1839_v2 = vsel %vm1838_vm4, %v2448_v54, %v1837_v60 }
0x10aa   :  { %v1787_v40 = vsel %vm1786_vm7, %v2446_v28, %v1783_v49  ;;  %v2362_v49 = vld [vmem:[#allocation7 + $0x117] ss:$0 sm:$0xff] }
0x10ab   :  { %v1822_v41 = vsel %vm1821_vm1, %v1814_v58, 0.0  ;;  %v1798_v46 = vmul.f32 %v1787_v40, %v1764_v13 }
0x10ac   :  { %1823 = vadd.xlane.f32.xlu0 %v1822_v41 }
0x10ad   :  { %v1802_v45 = vmul.f32 %v2357_v31, %v1798_v46  ;;  %v2280_v31 = vld [vmem:[#allocation6 + $0x128] sm:$0xff] }
0x10ae   :  { %1956 = vmatpush.bf16.msrb.mxu2 %v2280_v31 }
0x10af   :  { %v1806_v47 = vadd.f32 %v2358_v35, %v1802_v45  ;;  %v2360_v35 = vld [vmem:[#allocation7 + $0x116] ss:$0 sm:$0xff] }
0x10b1   :  { %v1818_v48 = vsel %vm1817_vm8, %v1806_v47, 0.0 }
0x10b2   :  { %1819 = vadd.xlane.f32.xlu2 %v1818_v48  ;;  %1957 = vmatpush.bf16.msrb.mxu2 %v2279_v32 }
0x111f   :  { %v1824_v59 = vpop.xlane.xlu0 %1823 }
0x1120   :  { %v1829_v62 = vrot.slane %v1824_v59, 7 }
0x1125   :  { %v1820_v61 = vpop.xlane.xlu2 %1819 }
0x1126   :  { %v1828_v63 = vrot.slane %v1820_v61, 7 }
0x1128   :  { %v1830_v36 = vsel %vm1827_vm2, %v1828_v63, %v1829_v62  ;;  %v2282_v63 = vld [vmem:[#allocation6 + $0x138] sm:$0xff] }
0x1129   :  { %v1832_v3 = vadd.f32 %v1830_v36, %v1811_v0  ;;  %2023 = vmatpush.bf16.msra.mxu3 %v2282_v63  ;;  %v2281_v0 = vld [vmem:[#allocation6 + $0x130] sm:$0xff] }
0x112b   :  { %v1840_v4 = vmul.f32 %v1839_v2, %v1832_v3  ;;  %v2363_v3 = vld [vmem:[#allocation7 + $0x118] ss:$0 sm:$0xff] }
0x112d   :  { %1843 = vperm.xlu2 %2336, %v1840_v4   ;;  %2024 = vmatpush.bf16.msra.mxu3 %v2281_v0 }
0x1187   :  { %v1844_v37 = vpop.permute.xlu2 %1843 }
0x1188   :  { %v1847_v5 = vrot.slane %v1844_v37, 1  ;;  %v1848_v7 = vrot.slane %v1844_v37, 2  ;;  %v1846_v11 = vsub.f32 %v2943_v17, %v1844_v37 }
0x118a   :  { %v1851_v8 = vsub.f32 %v1806_v47, %v1847_v5  ;;  %v1852_v9 = vsub.f32 %v1807_v53, %v1848_v7  ;;  %v1853_v13 = vmul.f32 %v1846_v11, %v1846_v11 }
0x118c   :  { %v1857_v10 = vmul.f32 %v1851_v8, %v1851_v8  ;;  %v1858_v42 = vmul.f32 %v1852_v9, %v1852_v9  ;;  %v1854_v14 = vsel %vm1808_vm11, %v1853_v13, 0.0 }
0x118e   :  { %v1864_v6 = vsel %vm1817_vm8, %v1857_v10, 0.0  ;;  %v1861_v12 = vrot.slane %v1858_v42, 7  ;;  %v2364_v10 = vld [vmem:[#allocation7 + $0x119] ss:$0 sm:$0xff] }
0x118f   :  { %1865 = vadd.xlane.f32.xlu0 %v1864_v6 }
0x1190   :  { %v1867_v43 = vsel %vm1821_vm1, %v1861_v12, 0.0 }
0x1191   :  { %1868 = vadd.xlane.f32.xlu1 %v1867_v43 }
0x1197   :  { %1855 = vadd.xlane.f32.xlu0 %v1854_v14 }
0x1202   :  { %v1866_v15 = vpop.xlane.xlu0 %1865 }
0x1203   :  { %v1872_v19 = vrot.slane %v1866_v15, 7 }
0x1204   :  { %v1869_v16 = vpop.xlane.xlu1 %1868 }
0x1205   :  { %v1873_v18 = vrot.slane %v1869_v16, 7 }
0x1207   :  { %v1874_v44 = vsel %vm1827_vm2, %v1872_v19, %v1873_v18 }
0x120a   :  { %v1856_v21 = vpop.xlane.xlu0 %1855 }
0x120b   :  { %v1876_v22 = vadd.f32 %v1874_v44, %v1856_v21 }
0x120d   :  { %v1877_v17 = vmul.f32 %v1876_v22, %v1839_v2 }
0x120f   :  { %v1878_v23 = vadd.f32 1e-05, %v1877_v17 }
0x1211   :  { %2449 = vrsqrt.f32 %v1878_v23  ;;  %vm1885_vm6 = vweird.f32 %v1878_v23 }
0x1217   :  { %v2450_v24 = vpop.eup %2449 }
0x1218   :  { %v1880_v20 = vmul.f32 %v2450_v24, %v1878_v23  ;;  %vm1886_vm5 = vweird.f32 %v2450_v24 }
0x1219   :  { %vm1887_vm9 = vmor %vm1885_vm6, %vm1886_vm5 }
0x121a   :  { %v1881_v25 = vmul.f32 %v2450_v24, %v1880_v20 }
0x121c   :  { %v1882_v26 = vmul.f32 0.5, %v1881_v25 }
0x121e   :  { %v1883_v50 = vsub.f32 1.5, %v1882_v26 }
0x1220   :  { %v1884_v27 = vmul.f32 %v2450_v24, %v1883_v50 }
0x1222   :  { %v1888_v28 = vsel %vm1887_vm9, %v2450_v24, %v1884_v27 }
0x1223   :  { %1891 = vperm.xlu1 %2337, %v1888_v28  }
0x1295   :  { %v1892_v34 = vpop.permute.xlu1 %1891 }
0x1296   :  { %v1894_v1 = vmul.f32 %v1892_v34, %v1846_v11  ;;  %v1901_v39 = vrot.slane %v1892_v34, 1  ;;  %v1902_v53 = vrot.slane %v1892_v34, 2 }
0x1298   :  { %v1897_v58 = vmul.f32 %v2359_v33, %v1894_v1  ;;  %v1905_v40 = vmul.f32 %v1901_v39, %v1851_v8  ;;  %v1906_v41 = vmul.f32 %v1902_v53, %v1852_v9 }
0x129a   :  { %v1900_v46 = vadd.f32 %v2360_v35, %v1897_v58  ;;  %v1909_v45 = vmul.f32 %v2361_v38, %v1905_v40  ;;  %v1910_v47 = vmul.f32 %v2361_v38, %v1906_v41 }
0x129c   :  { %v1913_v48 = vadd.f32 %v2362_v49, %v1909_v45  ;;  %v1914_v51 = vadd.f32 %v2362_v49, %v1910_v47  ;;  %v1919_v52 = vpack.c.bf16 %v1900_v46, %v1900_v46 }
0x129e   :  { %v1924_v54 = vpack.c.bf16 %v1913_v48, %v1913_v48  ;;  %v1925_v55 = vpack.c.bf16 %v1914_v51, %v1914_v51  ;;  %2233 = vmatmul.msk.bf16.vlgmr.msrb.gmra.mxu1 %vm128_vm3, %v1919_v52 }
0x12a0   :  { %v1928_v56 = vunpack.c.l.b16 %v1924_v54  ;;  %v1929_v57 = vunpack.c.l.b16 %v1925_v55 }
0x12a2   :  { %v1930_v59 = vrot.slane %v1928_v56, 7  ;;  %v1931_v60 = vrot.slane %v1929_v57, 6 }
0x12a4   :  { %v1933_v61 = vsel %vm1932_vm10, %v1931_v60, %v1930_v59 }
0x12a5   :  { %v1934_v62 = vpack.c.b16 %v1933_v61, %v1933_v61 }
0x12a7   :  { %2224 = vmatmul.msk.bf16.vlgmr.msrb.gmra.mxu2 %vm128_vm3, %v1934_v62 }
0x131b   :  { %v1987_v36 = vpop.f32.mrf.mxu1 }
0x1323   :  { %v1989_v2 = vpop.f32.mrf.mxu1 }
0x132a   :  { %v1959_v4 = vpop.f32.mrf.mxu2 }
0x132b   :  { %v1988_v37 = vadd.f32 %v1987_v36, %v1959_v4 }
0x132d   :  { %v1993_v5 = vadd.f32 %v2363_v3, %v1988_v37 }
0x132f   :  { %v1994_v7 = vmax.f32 %v1993_v5, 0.0 }
0x1331   :  { %v1999_v8 = vpack.c.bf16 %v1994_v7, %v1994_v7 }
0x1332   :  { %v1961_v9 = vpop.f32.mrf.mxu2 }
0x1333   :  { %2242 = vmatmul.msk.bf16.vlgmr.msra.gmra.mxu3 %vm128_vm3, %v1999_v8 }
0x13b6   :  { %v2026_v42 = vpop.f32.mrf.mxu3 }
0x13b7   :  { %v2027_v11 = vadd.f32 %v2364_v10, %v2026_v42 }
0x13b9   :  { %2030 = vst [vmem:[%s2967_s4] sm:$0x3] %v2027_v11 }
0x13be   :  { %v2028_v6 = vpop.f32.mrf.mxu3 }
0x13bf   :  { %2035 = vsyncpa [#allocation3], 1 }
0x13c0   :  { %2036 = vsyncpa [#allocation5], 1 }
0x13c1   :  { %2037 = vsyncpa [#allocation8], 1 }

</bundles_post_ra>
